<compile_context>
chip_gen: v6e
topology: v6e:2x2x1
jax: 0.10.0
libtpu: 0.0.40
codegen_flags: <defaults>
</compile_context>

<pallas_src>
import functools

import numpy as np
import jax
import jax.numpy as jnp
from jax import lax
from jax.experimental import pallas as pl
from jax.experimental.pallas import tpu as pltpu


def _round_up(x, m):
    return ((x + m - 1) // m) * m


# ---------------------------------------------------------------------------
# Kernel 1: tiled matmul with fused bias + activation.
# ---------------------------------------------------------------------------
def _mm_bias_act_kernel(a_ref, b_ref, bias_ref, o_ref, *, act):
    acc = jnp.dot(a_ref[...], b_ref[...], preferred_element_type=jnp.float32)
    acc = acc + bias_ref[...]
    if act == "relu":
        acc = jnp.maximum(acc, 0.0)
    elif act == "sigmoid":
        acc = jax.nn.sigmoid(acc)
    o_ref[...] = acc


def _rowdot_bias_act_kernel(a_ref, bt_ref, bias_ref, o_ref, *, act):
    # Cout == 1 path: multiply + lane reduction on the VPU/XLU (an N=1 MXU
    # matmul would be <1% MXU utilization and previously forced 128x padding).
    a = a_ref[...].astype(jnp.float32)
    bt = bt_ref[...].astype(jnp.float32)            # (1, K), sublane-broadcast
    acc = jnp.sum(a * bt, axis=-1, keepdims=True)   # (tm, 1)
    acc = acc + bias_ref[...]
    if act == "relu":
        acc = jnp.maximum(acc, 0.0)
    elif act == "sigmoid":
        acc = jax.nn.sigmoid(acc)
    o_ref[...] = acc


def matmul_bias_act(a, b, bias, act="none", tm=256):
    """act(A @ B + bias).  A:(M,K)  B:(K,N)  bias:(N,) -> (M,N) float32.

    bf16 operands / f32 accumulate; K and N are never padded (full-extent
    last-dim blocks); only M is padded up to the row tile.
    """
    M, K = a.shape
    K2, N = b.shape
    assert K == K2
    a = a.astype(jnp.bfloat16)

    Mp8 = _round_up(M, 8)
    tm_eff = min(tm, Mp8)
    if 8 < Mp8 <= tm:
        # give megacore parts (v7x) at least two grid steps when possible
        tm_eff = _round_up((Mp8 + 1) // 2, 8)
    Mp = _round_up(M, tm_eff)
    if Mp != M:
        a = jnp.pad(a, ((0, Mp - M), (0, 0)))
    grid = (Mp // tm_eff,)

    if N == 1:
        kern = functools.partial(_rowdot_bias_act_kernel, act=act)
        b_arg = b.reshape(1, K).astype(jnp.bfloat16)
        bias_arg = bias.reshape(1, 1).astype(jnp.float32)
        in_specs = [
            pl.BlockSpec((tm_eff, K), lambda i: (i, 0)),
            pl.BlockSpec((1, K), lambda i: (0, 0)),
            pl.BlockSpec((1, 1), lambda i: (0, 0)),
        ]
        flops = 2 * M * K
    else:
        kern = functools.partial(_mm_bias_act_kernel, act=act)
        b_arg = b.astype(jnp.bfloat16)
        bias_arg = bias.reshape(1, N).astype(jnp.float32)
        in_specs = [
            pl.BlockSpec((tm_eff, K), lambda i: (i, 0)),
            pl.BlockSpec((K, N), lambda i: (0, 0)),
            pl.BlockSpec((1, N), lambda i: (0, 0)),
        ]
        flops = 2 * M * K * N

    out = pl.pallas_call(
        kern,
        out_shape=jax.ShapeDtypeStruct((Mp, N), jnp.float32),
        grid=grid,
        in_specs=in_specs,
        out_specs=pl.BlockSpec((tm_eff, N), lambda i: (i, 0)),
        compiler_params=pltpu.CompilerParams(
            dimension_semantics=("parallel",)),
        cost_estimate=pl.CostEstimate(
            flops=flops,
            transcendentals=(M * N if act == "sigmoid" else 0),
            bytes_accessed=2 * Mp * K + 2 * K * N + 4 * Mp * N + 4 * N),
    )(a, b_arg, bias_arg)
    return out[:M] if Mp != M else out


# ---------------------------------------------------------------------------
# Kernel 2: the whole 1-channel PFA pyramid (5 factored convs + 3 bilinear
# align_corners upsamples + residual adds) fused in one kernel; every op is a
# small structured matmul kept in VMEM.  Grid over batch.
# ---------------------------------------------------------------------------
def _pfa_pyramid_kernel(y1_ref, b_ref,
                        k12_ref, l21_ref, r21_ref, k22_ref,
                        l31_ref, r31_ref, k32_ref,
                        uh32_ref, uw32_ref, uh21_ref, uw21_ref,
                        uh10_ref, uw10_ref, o_ref):
    def mm(a, b):
        return jnp.dot(a, b, preferred_element_type=jnp.float32)

    def bias(k):
        return b_ref[0:1, k:k + 1]                  # (1,1) -> broadcast add

    y1 = y1_ref[0]                                                   # (H1,W1)
    x1 = jnp.maximum(mm(k12_ref[...], y1) + bias(0), 0.0)            # conv12
    t = jnp.maximum(mm(mm(l21_ref[...], y1), r21_ref[...]) + bias(1), 0.0)  # conv21
    x2 = jnp.maximum(mm(k22_ref[...], t) + bias(2), 0.0)             # conv22
    u = jnp.maximum(mm(mm(l31_ref[...], t), r31_ref[...]) + bias(3), 0.0)   # conv31
    u = jnp.maximum(mm(k32_ref[...], u) + bias(4), 0.0)              # conv32
    u = mm(mm(uh32_ref[...], u), uw32_ref[...]) + x2                 # up -> size2, add
    u = mm(mm(uh21_ref[...], u), uw21_ref[...]) + x1                 # up -> size1, add
    o_ref[0] = mm(mm(uh10_ref[...], u), uw10_ref[...])               # up -> size0


def pfa_pyramid(y1, biases, mats, out_hw):
    B, H1, W1 = y1.shape
    H0, W0 = out_hw
    mat_specs = [pl.BlockSpec(m.shape, lambda b: (0, 0)) for m in mats]
    return pl.pallas_call(
        _pfa_pyramid_kernel,
        out_shape=jax.ShapeDtypeStruct((B, H0, W0), jnp.float32),
        grid=(B,),
        in_specs=[pl.BlockSpec((1, H1, W1), lambda b: (b, 0, 0)),
                  pl.BlockSpec((1, 8), lambda b: (0, 0))] + mat_specs,
        out_specs=pl.BlockSpec((1, H0, W0), lambda b: (b, 0, 0)),
        compiler_params=pltpu.CompilerParams(
            dimension_semantics=("parallel",)),
    )(y1, biases, *mats)


# ---------------------------------------------------------------------------
# Kernel 3: fused epilogue  out = x * (pfa * w_conv + b_conv) + x_gp
# ---------------------------------------------------------------------------
def _fapm_combine_kernel(x_ref, pfa_ref, gp_ref, wc_ref, bc_ref, o_ref):
    x_pfa = pfa_ref[...] * wc_ref[...] + bc_ref[...]   # conv1x1(1 -> C) of pfa
    o_ref[...] = x_ref[...] * x_pfa + gp_ref[...]


def fapm_combine(x, pfa, x_gp, wc, bc):
    B, H, W, C = x.shape
    return pl.pallas_call(
        _fapm_combine_kernel,
        out_shape=jax.ShapeDtypeStruct((B, H, W, C), jnp.float32),
        grid=(B,),
        in_specs=[
            pl.BlockSpec((1, H, W, C), lambda b: (b, 0, 0, 0)),
            pl.BlockSpec((1, H, W, 1), lambda b: (b, 0, 0, 0)),
            pl.BlockSpec((1, 1, 1, C), lambda b: (b, 0, 0, 0)),
            pl.BlockSpec((1, 1, 1, C), lambda b: (0, 0, 0, 0)),
            pl.BlockSpec((1, 1, 1, C), lambda b: (0, 0, 0, 0)),
        ],
        out_specs=pl.BlockSpec((1, H, W, C), lambda b: (b, 0, 0, 0)),
        compiler_params=pltpu.CompilerParams(
            dimension_semantics=("parallel",)),
        cost_estimate=pl.CostEstimate(
            flops=3 * B * H * W * C, transcendentals=0,
            bytes_accessed=8 * B * H * W * C + 4 * B * H * W + 12 * B * C),
    )(x, pfa, x_gp, wc, bc)


# ---------------------------------------------------------------------------
# Structured-matrix builders (1-D convs, subsampling, bilinear align_corners)
# ---------------------------------------------------------------------------
def conv1d_matrix(w, n_in, stride, pad):
    """(n_out, n_in) matrix M with (M @ v)[o] = sum_t v[stride*o + t - pad]*w[t]
    (torch cross-correlation with zero padding)."""
    k = int(w.shape[0])
    n_out = (n_in + 2 * pad - k) // stride + 1
    o = jnp.arange(n_out)[:, None, None]
    i = jnp.arange(n_in)[None, :, None]
    t = jnp.arange(k)[None, None, :]
    mask = (i == stride * o + t - pad).astype(w.dtype)
    return jnp.sum(mask * w[None, None, :], axis=-1)


def subsample_matrix(n_out, n_in, stride=2):
    m = np.zeros((n_out, n_in), np.float32)
    m[np.arange(n_out), stride * np.arange(n_out)] = 1.0
    return jnp.asarray(m)


def interp_matrix(n_out, n_in):
    """1-D bilinear align_corners=True interpolation matrix (n_out, n_in)."""
    m = np.zeros((n_out, n_in), np.float32)
    if n_in == 1:
        m[:, 0] = 1.0
        return jnp.asarray(m)
    for o in range(n_out):
        pos = 0.0 if n_out == 1 else o * (n_in - 1) / (n_out - 1)
        i0 = min(int(np.floor(pos)), n_in - 1)
        i1 = min(i0 + 1, n_in - 1)
        f = pos - i0
        m[o, i0] += 1.0 - f
        m[o, i1] += f
    return jnp.asarray(m)


# ---------------------------------------------------------------------------
# Parameters (deterministic, BN folded in eval mode: mean=0, var=1, g=1, b=0)
# ---------------------------------------------------------------------------
def fapm_params(key, channels):
    C = channels
    ks = jax.random.split(key, 10)
    bn_s = 1.0 / np.sqrt(1.0 + 1e-5)

    def w(k, shape, fan_in):
        return jax.random.normal(k, shape, jnp.float32) / np.sqrt(fan_in)

    return {
        # ConvBNAct weights (conv bias=False, BN folded)
        "w11": w(ks[0], (7, C), 7 * C) * bn_s,        # conv11: (1,7) s2, C -> 1
        "b11": jnp.zeros((1,), jnp.float32),
        "w12": w(ks[1], (7,), 7) * bn_s,              # conv12: (7,1)
        "w21": w(ks[2], (5,), 5) * bn_s,              # conv21: (1,5) s2
        "w22": w(ks[3], (5,), 5) * bn_s,              # conv22: (5,1)
        "w31": w(ks[4], (3,), 3) * bn_s,              # conv31: (1,3) s2
        "w32": w(ks[5], (3,), 3) * bn_s,              # conv32: (3,1)
        "bias_pyr": jnp.zeros((1, 8), jnp.float32),   # b12,b21,b22,b31,b32 (BN beta=0)
        # conv1x1(1, C)
        "wconv": w(ks[6], (C,), 1),
        "bconv": 0.01 * jax.random.normal(ks[7], (C,), jnp.float32),
        # gp: AdaptiveAvgPool2d(1) + conv1x1(C, C) -- stored in (Cin, Cout) matmul form
        "wgp": w(ks[8], (C, C), C),
        "bgp": 0.01 * jax.random.normal(ks[9], (C,), jnp.float32),
    }


# ---------------------------------------------------------------------------
# FAPM forward
# ---------------------------------------------------------------------------
def fapm_forward(params, x_nchw):
    x = jnp.transpose(x_nchw, (0, 2, 3, 1)).astype(jnp.float32)    # NCHW -> NHWC
    B, H0, W0, C = x.shape

    # ---- conv11: (1,7) stride-2 ConvBNAct, C -> 1 channel (bf16 Pallas) ----
    H1 = (H0 - 1) // 2 + 1
    W1 = (W0 + 6 - 7) // 2 + 1
    x_even = x[:, ::2].astype(jnp.bfloat16)                        # stride-2 rows
    xp = jnp.pad(x_even, ((0, 0), (0, 0), (3, 3), (0, 0)))
    cols = [xp[:, :, t: t + 2 * W1 - 1: 2, :] for t in range(7)]   # 7 width taps
    a = jnp.concatenate(cols, axis=-1).reshape(B * H1 * W1, 7 * C)
    y1 = matmul_bias_act(a, params["w11"].reshape(7 * C, 1),
                         params["b11"], act="relu")
    y1 = y1.reshape(B, H1, W1)

    # ---- remaining 1-channel pyramid: fully fused in one kernel ------------
    H2 = (H1 - 1) // 2 + 1
    W2 = (W1 + 4 - 5) // 2 + 1
    H3 = (H2 - 1) // 2 + 1
    W3 = (W2 + 2 - 3) // 2 + 1
    mats = [
        conv1d_matrix(params["w12"], H1, 1, 3),       # K12  (H1,H1)
        subsample_matrix(H2, H1),                     # L21  (H2,H1)
        conv1d_matrix(params["w21"], W1, 2, 2).T,     # R21  (W1,W2)
        conv1d_matrix(params["w22"], H2, 1, 2),       # K22  (H2,H2)
        subsample_matrix(H3, H2),                     # L31  (H3,H2)
        conv1d_matrix(params["w31"], W2, 2, 1).T,     # R31  (W2,W3)
        conv1d_matrix(params["w32"], H3, 1, 1),       # K32  (H3,H3)
        interp_matrix(H2, H3),                        # UH32
        interp_matrix(W2, W3).T,                      # UW32
        interp_matrix(H1, H2),                        # UH21
        interp_matrix(W1, W2).T,                      # UW21
        interp_matrix(H0, H1),                        # UH10
        interp_matrix(W0, W1).T,                      # UW10
    ]
    pfa = pfa_pyramid(y1, params["bias_pyr"], mats, (H0, W0))      # (B,H0,W0)

    # ---- gp branch: global average pool + 1x1 conv (Pallas matmul) ---------
    x_mean = jnp.mean(x, axis=(1, 2))                               # (B, C)
    x_gp = matmul_bias_act(x_mean, params["wgp"], params["bgp"])    # (B, C)

    # ---- fused epilogue: x * conv1x1(pfa) + broadcast(x_gp) ----------------
    out = fapm_combine(x,
                       pfa.reshape(B, H0, W0, 1),
                       x_gp.reshape(B, 1, 1, C),
                       params["wconv"].reshape(1, 1, 1, C),
                       params["bconv"].reshape(1, 1, 1, C))
    return jnp.transpose(out, (0, 3, 1, 2))                         # NHWC -> NCHW


# ---------------------------------------------------------------------------
# Pure-JAX reference (lax.conv + gather bilinear) for a correctness check
# ---------------------------------------------------------------------------
def _bilinear_ac(x, out_h, out_w):
    B, H, W, C = x.shape
    ys = jnp.linspace(0.0, float(H - 1), out_h)
    xs = jnp.linspace(0.0, float(W - 1), out_w)
    y0 = jnp.floor(ys).astype(jnp.int32)
    x0 = jnp.floor(xs).astype(jnp.int32)
    y1 = jnp.minimum(y0 + 1, H - 1)
    x1 = jnp.minimum(x0 + 1, W - 1)
    wy = (ys - y0)[None, :, None, None]
    wx = (xs - x0)[None, None, :, None]
    top = x[:, y0][:, :, x0] * (1 - wx) + x[:, y0][:, :, x1] * wx
    bot = x[:, y1][:, :, x0] * (1 - wx) + x[:, y1][:, :, x1] * wx
    return top * (1 - wy) + bot * wy


def fapm_reference(params, x_nchw):
    x = jnp.transpose(x_nchw, (0, 2, 3, 1)).astype(jnp.float32)
    B, H0, W0, C = x.shape
    hi = lax.Precision.HIGHEST
    q = lambda t: t.astype(jnp.bfloat16).astype(jnp.float32)

    def conv(v, w4, stride, pad):
        return lax.conv_general_dilated(
            v, w4, stride, pad,
            dimension_numbers=("NHWC", "HWIO", "NHWC"), precision=hi)

    y1 = jnp.maximum(conv(q(x), q(params["w11"])[None, :, :, None],
                          (2, 2), ((0, 0), (3, 3))) + params["b11"], 0.0)

    def c1(v, w1d, kh, kw, stride, pad):
        return jnp.maximum(conv(v, w1d.reshape(kh, kw, 1, 1), stride, pad), 0.0)

    x1 = c1(y1, params["w12"], 7, 1, (1, 1), ((3, 3), (0, 0)))
    t = c1(y1, params["w21"], 1, 5, (2, 2), ((0, 0), (2, 2)))
    x2 = c1(t, params["w22"], 5, 1, (1, 1), ((2, 2), (0, 0)))
    u = c1(t, params["w31"], 1, 3, (2, 2), ((0, 0), (1, 1)))
    u = c1(u, params["w32"], 3, 1, (1, 1), ((1, 1), (0, 0)))
    u = _bilinear_ac(u, x2.shape[1], x2.shape[2]) + x2
    u = _bilinear_ac(u, x1.shape[1], x1.shape[2]) + x1
    pfa = _bilinear_ac(u, H0, W0)                                   # (B,H0,W0,1)

    x_pfa = pfa * params["wconv"][None, None, None, :] + params["bconv"]
    x_mean = jnp.mean(x, axis=(1, 2))
    x_gp = jnp.dot(q(x_mean), q(params["wgp"]), precision=hi) + params["bgp"]
    out = x * x_pfa + x_gp[:, None, None, :]
    return jnp.transpose(out, (0, 3, 1, 2))


# ---------------------------------------------------------------------------
if __name__ == "__main__":
    key = jax.random.PRNGKey(0)
    kx, kp = jax.random.split(key)
    B, C, H, W = 2, 32, 16, 16
    x = jax.random.normal(kx, (B, C, H, W), jnp.float32)            # NCHW input
    params = fapm_params(kp, C)

    fwd = jax.jit(fapm_forward)
    out = jax.block_until_ready(fwd(params, x))

    assert out.shape == (B, C, H, W), out.shape
    assert out.dtype == jnp.float32
    assert bool(jnp.all(jnp.isfinite(out)))

    ref = fapm_reference(params, x)
    err = float(jnp.max(jnp.abs(out - ref)))
    assert err < 5e-2, f"mismatch vs pure-JAX reference: max abs err = {err}"

    print("KERNEL_OK")
</pallas_src>

<mosaic_0001>
module attributes {stable_mosaic.version = 11 : i64} {
  func.func @_mm_bias_act_kernel(%arg0: i32, %arg1: memref<8x32xbf16, #tpu.memory_space<vmem>>, %arg2: memref<32x32xbf16, #tpu.memory_space<vmem>>, %arg3: memref<1x32xf32, #tpu.memory_space<vmem>>, %arg4: memref<8x32xf32, #tpu.memory_space<vmem>>) attributes {dimension_semantics = [#tpu.dimension_semantics<parallel>], iteration_bounds = array<i64: 1>, scalar_prefetch = 0 : i64, scratch_operands = 0 : i64, tpu.core_type = #tpu.core_type<tc>, window_params = [{transform_indices = @transform_0, window_bounds = array<i64: 8, 32>}, {pipeline_mode = #tpu.pipeline_mode<synchronous>, transform_indices = @transform_1, window_bounds = array<i64: 32, 32>}, {pipeline_mode = #tpu.pipeline_mode<synchronous>, transform_indices = @transform_2, window_bounds = array<i64: 1, 32>}, {transform_indices = @transform_3, window_bounds = array<i64: 8, 32>}]} {
    %c0 = arith.constant 0 : index
    %c0_0 = arith.constant 0 : index
    %0 = vector.load %arg1[%c0, %c0_0] : memref<8x32xbf16, #tpu.memory_space<vmem>>, vector<8x32xbf16>
    %c0_1 = arith.constant 0 : index
    %c0_2 = arith.constant 0 : index
    %1 = vector.load %arg2[%c0_1, %c0_2] : memref<32x32xbf16, #tpu.memory_space<vmem>>, vector<32x32xbf16>
    %cst = arith.constant dense<0.000000e+00> : vector<8x32xf32>
    %2 = tpu.matmul %0, %1, %cst {dimension_numbers = #tpu.dot_dimension_numbers<[1], [0], [0], [1], [0, 0, 1, 1], [], []>} : vector<8x32xbf16>, vector<32x32xbf16>, vector<8x32xf32> -> vector<8x32xf32>
    %c0_3 = arith.constant 0 : index
    %c0_4 = arith.constant 0 : index
    %3 = vector.load %arg3[%c0_3, %c0_4] : memref<1x32xf32, #tpu.memory_space<vmem>>, vector<1x32xf32>
    %4 = vector.broadcast %3 : vector<1x32xf32> to vector<8x32xf32>
    %5 = arith.addf %2, %4 : vector<8x32xf32>
    %c0_5 = arith.constant 0 : index
    %c0_6 = arith.constant 0 : index
    %6 = vector.load %arg4[%c0_5, %c0_6] : memref<8x32xf32, #tpu.memory_space<vmem>>, vector<8x32xf32>
    tpu.vector_store %arg4[%c0_5, %c0_6], %5 {strides = array<i32>} : memref<8x32xf32, #tpu.memory_space<vmem>>, vector<8x32xf32>,
    return
  }
  func.func @transform_0(%arg0: i32) -> (i32, i32) {
    %c0_i32 = arith.constant 0 : i32
    %c0_i32_0 = arith.constant 0 : i32
    return %arg0, %c0_i32 : i32, i32
  }
  func.func @transform_1(%arg0: i32) -> (i32, i32) {
    %c0_i32 = arith.constant 0 : i32
    %c0_i32_0 = arith.constant 0 : i32
    %c0_i32_1 = arith.constant 0 : i32
    return %c0_i32, %c0_i32_0 : i32, i32
  }
  func.func @transform_2(%arg0: i32) -> (i32, i32) {
    %c0_i32 = arith.constant 0 : i32
    %c0_i32_0 = arith.constant 0 : i32
    %c0_i32_1 = arith.constant 0 : i32
    return %c0_i32, %c0_i32_0 : i32, i32
  }
  func.func @transform_3(%arg0: i32) -> (i32, i32) {
    %c0_i32 = arith.constant 0 : i32
    %c0_i32_0 = arith.constant 0 : i32
    return %arg0, %c0_i32 : i32, i32
  }
}

module attributes {stable_mosaic.version = 11 : i64} {
  func.func @_rowdot_bias_act_kernel(%arg0: i32, %arg1: memref<64x224xbf16, #tpu.memory_space<vmem>>, %arg2: memref<1x224xbf16, #tpu.memory_space<vmem>>, %arg3: memref<1x1xf32, #tpu.memory_space<vmem>>, %arg4: memref<64x1xf32, #tpu.memory_space<vmem>>) attributes {dimension_semantics = [#tpu.dimension_semantics<parallel>], iteration_bounds = array<i64: 2>, scalar_prefetch = 0 : i64, scratch_operands = 0 : i64, tpu.core_type = #tpu.core_type<tc>, window_params = [{transform_indices = @transform_0, window_bounds = array<i64: 64, 224>}, {pipeline_mode = #tpu.pipeline_mode<synchronous>, transform_indices = @transform_1, window_bounds = array<i64: 1, 224>}, {pipeline_mode = #tpu.pipeline_mode<synchronous>, transform_indices = @transform_2, window_bounds = array<i64: 1, 1>}, {transform_indices = @transform_3, window_bounds = array<i64: 64, 1>}]} {
    %c0 = arith.constant 0 : index
    %c0_0 = arith.constant 0 : index
    %0 = vector.load %arg1[%c0, %c0_0] : memref<64x224xbf16, #tpu.memory_space<vmem>>, vector<64x224xbf16>
    %1 = arith.extf %0 : vector<64x224xbf16> to vector<64x224xf32>
    %c0_1 = arith.constant 0 : index
    %c0_2 = arith.constant 0 : index
    %2 = vector.load %arg2[%c0_1, %c0_2] : memref<1x224xbf16, #tpu.memory_space<vmem>>, vector<1x224xbf16>
    %3 = arith.extf %2 : vector<1x224xbf16> to vector<1x224xf32>
    %4 = vector.broadcast %3 : vector<1x224xf32> to vector<64x224xf32>
    %5 = arith.mulf %1, %4 : vector<64x224xf32>
    %cst = arith.constant dense<0.000000e+00> : vector<64xf32>
    %6 = vector.multi_reduction <add>, %5, %cst [1] : vector<64x224xf32> to vector<64xf32>
    %7 = vector.shape_cast %6 : vector<64xf32> to vector<64x1xf32>
    %c0_3 = arith.constant 0 : index
    %c0_4 = arith.constant 0 : index
    %8 = vector.load %arg3[%c0_3, %c0_4] : memref<1x1xf32, #tpu.memory_space<vmem>>, vector<1x1xf32>
    %9 = vector.broadcast %8 : vector<1x1xf32> to vector<64x1xf32>
    %10 = arith.addf %7, %9 : vector<64x1xf32>
    %cst_5 = arith.constant 0.000000e+00 : f32
    %11 = vector.broadcast %cst_5 : f32 to vector<64x1xf32>
    %12 = arith.maximumf %10, %11 : vector<64x1xf32>
    %c0_6 = arith.constant 0 : index
    %c0_7 = arith.constant 0 : index
    %13 = vector.load %arg4[%c0_6, %c0_7] : memref<64x1xf32, #tpu.memory_space<vmem>>, vector<64x1xf32>
    tpu.vector_store %arg4[%c0_6, %c0_7], %12 {strides = array<i32>} : memref<64x1xf32, #tpu.memory_space<vmem>>, vector<64x1xf32>,
    return
  }
  func.func @transform_0(%arg0: i32) -> (i32, i32) {
    %c0_i32 = arith.constant 0 : i32
    %c0_i32_0 = arith.constant 0 : i32
    return %arg0, %c0_i32 : i32, i32
  }
  func.func @transform_1(%arg0: i32) -> (i32, i32) {
    %c0_i32 = arith.constant 0 : i32
    %c0_i32_0 = arith.constant 0 : i32
    %c0_i32_1 = arith.constant 0 : i32
    return %c0_i32, %c0_i32_0 : i32, i32
  }
  func.func @transform_2(%arg0: i32) -> (i32, i32) {
    %c0_i32 = arith.constant 0 : i32
    %c0_i32_0 = arith.constant 0 : i32
    %c0_i32_1 = arith.constant 0 : i32
    return %c0_i32, %c0_i32_0 : i32, i32
  }
  func.func @transform_3(%arg0: i32) -> (i32, i32) {
    %c0_i32 = arith.constant 0 : i32
    %c0_i32_0 = arith.constant 0 : i32
    return %arg0, %c0_i32 : i32, i32
  }
}

module attributes {stable_mosaic.version = 11 : i64} {
  func.func @_pfa_pyramid_kernel(%arg0: i32, %arg1: memref<1x8x8xf32, #tpu.memory_space<vmem>>, %arg2: memref<1x8xf32, #tpu.memory_space<vmem>>, %arg3: memref<8x8xf32, #tpu.memory_space<vmem>>, %arg4: memref<4x8xf32, #tpu.memory_space<vmem>>, %arg5: memref<8x4xf32, #tpu.memory_space<vmem>>, %arg6: memref<4x4xf32, #tpu.memory_space<vmem>>, %arg7: memref<2x4xf32, #tpu.memory_space<vmem>>, %arg8: memref<4x2xf32, #tpu.memory_space<vmem>>, %arg9: memref<2x2xf32, #tpu.memory_space<vmem>>, %arg10: memref<4x2xf32, #tpu.memory_space<vmem>>, %arg11: memref<2x4xf32, #tpu.memory_space<vmem>>, %arg12: memref<8x4xf32, #tpu.memory_space<vmem>>, %arg13: memref<4x8xf32, #tpu.memory_space<vmem>>, %arg14: memref<16x8xf32, #tpu.memory_space<vmem>>, %arg15: memref<8x16xf32, #tpu.memory_space<vmem>>, %arg16: memref<1x16x16xf32, #tpu.memory_space<vmem>>) attributes {dimension_semantics = [#tpu.dimension_semantics<parallel>], iteration_bounds = array<i64: 2>, scalar_prefetch = 0 : i64, scratch_operands = 0 : i64, tpu.core_type = #tpu.core_type<tc>, window_params = [{transform_indices = @transform_0, window_bounds = array<i64: 1, 8, 8>}, {pipeline_mode = #tpu.pipeline_mode<synchronous>, transform_indices = @transform_1, window_bounds = array<i64: 1, 8>}, {pipeline_mode = #tpu.pipeline_mode<synchronous>, transform_indices = @transform_2, window_bounds = array<i64: 8, 8>}, {pipeline_mode = #tpu.pipeline_mode<synchronous>, transform_indices = @transform_3, window_bounds = array<i64: 4, 8>}, {pipeline_mode = #tpu.pipeline_mode<synchronous>, transform_indices = @transform_4, window_bounds = array<i64: 8, 4>}, {pipeline_mode = #tpu.pipeline_mode<synchronous>, transform_indices = @transform_5, window_bounds = array<i64: 4, 4>}, {pipeline_mode = #tpu.pipeline_mode<synchronous>, transform_indices = @transform_6, window_bounds = array<i64: 2, 4>}, {pipeline_mode = #tpu.pipeline_mode<synchronous>, transform_indices = @transform_7, window_bounds = array<i64: 4, 2>}, {pipeline_mode = #tpu.pipeline_mode<synchronous>, transform_indices = @transform_8, window_bounds = array<i64: 2, 2>}, {pipeline_mode = #tpu.pipeline_mode<synchronous>, transform_indices = @transform_9, window_bounds = array<i64: 4, 2>}, {pipeline_mode = #tpu.pipeline_mode<synchronous>, transform_indices = @transform_10, window_bounds = array<i64: 2, 4>}, {pipeline_mode = #tpu.pipeline_mode<synchronous>, transform_indices = @transform_11, window_bounds = array<i64: 8, 4>}, {pipeline_mode = #tpu.pipeline_mode<synchronous>, transform_indices = @transform_12, window_bounds = array<i64: 4, 8>}, {pipeline_mode = #tpu.pipeline_mode<synchronous>, transform_indices = @transform_13, window_bounds = array<i64: 16, 8>}, {pipeline_mode = #tpu.pipeline_mode<synchronous>, transform_indices = @transform_14, window_bounds = array<i64: 8, 16>}, {transform_indices = @transform_15, window_bounds = array<i64: 1, 16, 16>}]} {
    %c0 = arith.constant 0 : index
    %c0_0 = arith.constant 0 : index
    %c0_1 = arith.constant 0 : index
    %0 = vector.load %arg1[%c0, %c0_0, %c0_1] : memref<1x8x8xf32, #tpu.memory_space<vmem>>, vector<1x8x8xf32>
    %1 = vector.shape_cast %0 : vector<1x8x8xf32> to vector<8x8xf32>
    %c0_2 = arith.constant 0 : index
    %c0_3 = arith.constant 0 : index
    %2 = vector.load %arg3[%c0_2, %c0_3] : memref<8x8xf32, #tpu.memory_space<vmem>>, vector<8x8xf32>
    %cst = arith.constant dense<0.000000e+00> : vector<8x8xf32>
    %3 = tpu.matmul %2, %1, %cst {dimension_numbers = #tpu.dot_dimension_numbers<[1], [0], [0], [1], [0, 0, 1, 1], [], []>} : vector<8x8xf32>, vector<8x8xf32>, vector<8x8xf32> -> vector<8x8xf32>
    %c0_4 = arith.constant 0 : index
    %c0_5 = arith.constant 0 : index
    %4 = vector.load %arg2[%c0_4, %c0_5] : memref<1x8xf32, #tpu.memory_space<vmem>>, vector<1x1xf32>
    %5 = vector.broadcast %4 : vector<1x1xf32> to vector<8x8xf32>
    %6 = arith.addf %3, %5 : vector<8x8xf32>
    %cst_6 = arith.constant 0.000000e+00 : f32
    %7 = vector.broadcast %cst_6 : f32 to vector<8x8xf32>
    %8 = arith.maximumf %6, %7 : vector<8x8xf32>
    %c0_7 = arith.constant 0 : index
    %c0_8 = arith.constant 0 : index
    %9 = vector.load %arg4[%c0_7, %c0_8] : memref<4x8xf32, #tpu.memory_space<vmem>>, vector<4x8xf32>
    %cst_9 = arith.constant dense<0.000000e+00> : vector<4x8xf32>
    %10 = tpu.matmul %9, %1, %cst_9 {dimension_numbers = #tpu.dot_dimension_numbers<[1], [0], [0], [1], [0, 0, 1, 1], [], []>} : vector<4x8xf32>, vector<8x8xf32>, vector<4x8xf32> -> vector<4x8xf32>
    %c0_10 = arith.constant 0 : index
    %c0_11 = arith.constant 0 : index
    %11 = vector.load %arg5[%c0_10, %c0_11] : memref<8x4xf32, #tpu.memory_space<vmem>>, vector<8x4xf32>
    %cst_12 = arith.constant dense<0.000000e+00> : vector<4x4xf32>
    %12 = tpu.matmul %10, %11, %cst_12 {dimension_numbers = #tpu.dot_dimension_numbers<[1], [0], [0], [1], [0, 0, 1, 1], [], []>} : vector<4x8xf32>, vector<8x4xf32>, vector<4x4xf32> -> vector<4x4xf32>
    %c0_13 = arith.constant 0 : index
    %c1 = arith.constant 1 : index
    %13 = vector.load %arg2[%c0_13, %c1] : memref<1x8xf32, #tpu.memory_space<vmem>>, vector<1x1xf32>
    %14 = vector.broadcast %13 : vector<1x1xf32> to vector<4x4xf32>
    %15 = arith.addf %12, %14 : vector<4x4xf32>
    %cst_14 = arith.constant 0.000000e+00 : f32
    %16 = vector.broadcast %cst_14 : f32 to vector<4x4xf32>
    %17 = arith.maximumf %15, %16 : vector<4x4xf32>
    %c0_15 = arith.constant 0 : index
    %c0_16 = arith.constant 0 : index
    %18 = vector.load %arg6[%c0_15, %c0_16] : memref<4x4xf32, #tpu.memory_space<vmem>>, vector<4x4xf32>
    %cst_17 = arith.constant dense<0.000000e+00> : vector<4x4xf32>
    %19 = tpu.matmul %18, %17, %cst_17 {dimension_numbers = #tpu.dot_dimension_numbers<[1], [0], [0], [1], [0, 0, 1, 1], [], []>} : vector<4x4xf32>, vector<4x4xf32>, vector<4x4xf32> -> vector<4x4xf32>
    %c0_18 = arith.constant 0 : index
    %c2 = arith.constant 2 : index
    %20 = vector.load %arg2[%c0_18, %c2] : memref<1x8xf32, #tpu.memory_space<vmem>>, vector<1x1xf32>
    %21 = vector.broadcast %20 : vector<1x1xf32> to vector<4x4xf32>
    %22 = arith.addf %19, %21 : vector<4x4xf32>
    %cst_19 = arith.constant 0.000000e+00 : f32
    %23 = vector.broadcast %cst_19 : f32 to vector<4x4xf32>
    %24 = arith.maximumf %22, %23 : vector<4x4xf32>
    %c0_20 = arith.constant 0 : index
    %c0_21 = arith.constant 0 : index
    %25 = vector.load %arg7[%c0_20, %c0_21] : memref<2x4xf32, #tpu.memory_space<vmem>>, vector<2x4xf32>
    %cst_22 = arith.constant dense<0.000000e+00> : vector<2x4xf32>
    %26 = tpu.matmul %25, %17, %cst_22 {dimension_numbers = #tpu.dot_dimension_numbers<[1], [0], [0], [1], [0, 0, 1, 1], [], []>} : vector<2x4xf32>, vector<4x4xf32>, vector<2x4xf32> -> vector<2x4xf32>
    %c0_23 = arith.constant 0 : index
    %c0_24 = arith.constant 0 : index
    %27 = vector.load %arg8[%c0_23, %c0_24] : memref<4x2xf32, #tpu.memory_space<vmem>>, vector<4x2xf32>
    %cst_25 = arith.constant dense<0.000000e+00> : vector<2x2xf32>
    %28 = tpu.matmul %26, %27, %cst_25 {dimension_numbers = #tpu.dot_dimension_numbers<[1], [0], [0], [1], [0, 0, 1, 1], [], []>} : vector<2x4xf32>, vector<4x2xf32>, vector<2x2xf32> -> vector<2x2xf32>
    %c0_26 = arith.constant 0 : index
    %c3 = arith.constant 3 : index
    %29 = vector.load %arg2[%c0_26, %c3] : memref<1x8xf32, #tpu.memory_space<vmem>>, vector<1x1xf32>
    %30 = vector.broadcast %29 : vector<1x1xf32> to vector<2x2xf32>
    %31 = arith.addf %28, %30 : vector<2x2xf32>
    %cst_27 = arith.constant 0.000000e+00 : f32
    %32 = vector.broadcast %cst_27 : f32 to vector<2x2xf32>
    %33 = arith.maximumf %31, %32 : vector<2x2xf32>
    %c0_28 = arith.constant 0 : index
    %c0_29 = arith.constant 0 : index
    %34 = vector.load %arg9[%c0_28, %c0_29] : memref<2x2xf32, #tpu.memory_space<vmem>>, vector<2x2xf32>
    %cst_30 = arith.constant dense<0.000000e+00> : vector<2x2xf32>
    %35 = tpu.matmul %34, %33, %cst_30 {dimension_numbers = #tpu.dot_dimension_numbers<[1], [0], [0], [1], [0, 0, 1, 1], [], []>} : vector<2x2xf32>, vector<2x2xf32>, vector<2x2xf32> -> vector<2x2xf32>
    %c0_31 = arith.constant 0 : index
    %c4 = arith.constant 4 : index
    %36 = vector.load %arg2[%c0_31, %c4] : memref<1x8xf32, #tpu.memory_space<vmem>>, vector<1x1xf32>
    %37 = vector.broadcast %36 : vector<1x1xf32> to vector<2x2xf32>
    %38 = arith.addf %35, %37 : vector<2x2xf32>
    %cst_32 = arith.constant 0.000000e+00 : f32
    %39 = vector.broadcast %cst_32 : f32 to vector<2x2xf32>
    %40 = arith.maximumf %38, %39 : vector<2x2xf32>
    %c0_33 = arith.constant 0 : index
    %c0_34 = arith.constant 0 : index
    %41 = vector.load %arg10[%c0_33, %c0_34] : memref<4x2xf32, #tpu.memory_space<vmem>>, vector<4x2xf32>
    %cst_35 = arith.constant dense<0.000000e+00> : vector<4x2xf32>
    %42 = tpu.matmul %41, %40, %cst_35 {dimension_numbers = #tpu.dot_dimension_numbers<[1], [0], [0], [1], [0, 0, 1, 1], [], []>} : vector<4x2xf32>, vector<2x2xf32>, vector<4x2xf32> -> vector<4x2xf32>
    %c0_36 = arith.constant 0 : index
    %c0_37 = arith.constant 0 : index
    %43 = vector.load %arg11[%c0_36, %c0_37] : memref<2x4xf32, #tpu.memory_space<vmem>>, vector<2x4xf32>
    %cst_38 = arith.constant dense<0.000000e+00> : vector<4x4xf32>
    %44 = tpu.matmul %42, %43, %cst_38 {dimension_numbers = #tpu.dot_dimension_numbers<[1], [0], [0], [1], [0, 0, 1, 1], [], []>} : vector<4x2xf32>, vector<2x4xf32>, vector<4x4xf32> -> vector<4x4xf32>
    %45 = arith.addf %44, %24 : vector<4x4xf32>
    %c0_39 = arith.constant 0 : index
    %c0_40 = arith.constant 0 : index
    %46 = vector.load %arg12[%c0_39, %c0_40] : memref<8x4xf32, #tpu.memory_space<vmem>>, vector<8x4xf32>
    %cst_41 = arith.constant dense<0.000000e+00> : vector<8x4xf32>
    %47 = tpu.matmul %46, %45, %cst_41 {dimension_numbers = #tpu.dot_dimension_numbers<[1], [0], [0], [1], [0, 0, 1, 1], [], []>} : vector<8x4xf32>, vector<4x4xf32>, vector<8x4xf32> -> vector<8x4xf32>
    %c0_42 = arith.constant 0 : index
    %c0_43 = arith.constant 0 : index
    %48 = vector.load %arg13[%c0_42, %c0_43] : memref<4x8xf32, #tpu.memory_space<vmem>>, vector<4x8xf32>
    %cst_44 = arith.constant dense<0.000000e+00> : vector<8x8xf32>
    %49 = tpu.matmul %47, %48, %cst_44 {dimension_numbers = #tpu.dot_dimension_numbers<[1], [0], [0], [1], [0, 0, 1, 1], [], []>} : vector<8x4xf32>, vector<4x8xf32>, vector<8x8xf32> -> vector<8x8xf32>
    %50 = arith.addf %49, %8 : vector<8x8xf32>
    %c0_45 = arith.constant 0 : index
    %c0_46 = arith.constant 0 : index
    %51 = vector.load %arg14[%c0_45, %c0_46] : memref<16x8xf32, #tpu.memory_space<vmem>>, vector<16x8xf32>
    %cst_47 = arith.constant dense<0.000000e+00> : vector<16x8xf32>
    %52 = tpu.matmul %51, %50, %cst_47 {dimension_numbers = #tpu.dot_dimension_numbers<[1], [0], [0], [1], [0, 0, 1, 1], [], []>} : vector<16x8xf32>, vector<8x8xf32>, vector<16x8xf32> -> vector<16x8xf32>
    %c0_48 = arith.constant 0 : index
    %c0_49 = arith.constant 0 : index
    %53 = vector.load %arg15[%c0_48, %c0_49] : memref<8x16xf32, #tpu.memory_space<vmem>>, vector<8x16xf32>
    %cst_50 = arith.constant dense<0.000000e+00> : vector<16x16xf32>
    %54 = tpu.matmul %52, %53, %cst_50 {dimension_numbers = #tpu.dot_dimension_numbers<[1], [0], [0], [1], [0, 0, 1, 1], [], []>} : vector<16x8xf32>, vector<8x16xf32>, vector<16x16xf32> -> vector<16x16xf32>
    %c0_51 = arith.constant 0 : index
    %c0_52 = arith.constant 0 : index
    %c0_53 = arith.constant 0 : index
    %55 = vector.load %arg16[%c0_51, %c0_52, %c0_53] : memref<1x16x16xf32, #tpu.memory_space<vmem>>, vector<1x16x16xf32>
    %56 = vector.shape_cast %55 : vector<1x16x16xf32> to vector<16x16xf32>
    %57 = vector.shape_cast %54 : vector<16x16xf32> to vector<1x16x16xf32>
    tpu.vector_store %arg16[%c0_51, %c0_52, %c0_53], %57 {strides = array<i32>} : memref<1x16x16xf32, #tpu.memory_space<vmem>>, vector<1x16x16xf32>,
    return
  }
  func.func @transform_0(%arg0: i32) -> (i32, i32, i32) {
    %c0_i32 = arith.constant 0 : i32
    %c0_i32_0 = arith.constant 0 : i32
    %c0_i32_1 = arith.constant 0 : i32
    return %arg0, %c0_i32, %c0_i32_0 : i32, i32, i32
  }
  func.func @transform_1(%arg0: i32) -> (i32, i32) {
    %c0_i32 = arith.constant 0 : i32
    %c0_i32_0 = arith.constant 0 : i32
    %c0_i32_1 = arith.constant 0 : i32
    return %c0_i32, %c0_i32_0 : i32, i32
  }
  func.func @transform_2(%arg0: i32) -> (i32, i32) {
    %c0_i32 = arith.constant 0 : i32
    %c0_i32_0 = arith.constant 0 : i32
    %c0_i32_1 = arith.constant 0 : i32
    return %c0_i32, %c0_i32_0 : i32, i32
  }
  func.func @transform_3(%arg0: i32) -> (i32, i32) {
    %c0_i32 = arith.constant 0 : i32
    %c0_i32_0 = arith.constant 0 : i32
    %c0_i32_1 = arith.constant 0 : i32
    return %c0_i32, %c0_i32_0 : i32, i32
  }
  func.func @transform_4(%arg0: i32) -> (i32, i32) {
    %c0_i32 = arith.constant 0 : i32
    %c0_i32_0 = arith.constant 0 : i32
    %c0_i32_1 = arith.constant 0 : i32
    return %c0_i32, %c0_i32_0 : i32, i32
  }
  func.func @transform_5(%arg0: i32) -> (i32, i32) {
    %c0_i32 = arith.constant 0 : i32
    %c0_i32_0 = arith.constant 0 : i32
    %c0_i32_1 = arith.constant 0 : i32
    return %c0_i32, %c0_i32_0 : i32, i32
  }
  func.func @transform_6(%arg0: i32) -> (i32, i32) {
    %c0_i32 = arith.constant 0 : i32
    %c0_i32_0 = arith.constant 0 : i32
    %c0_i32_1 = arith.constant 0 : i32
    return %c0_i32, %c0_i32_0 : i32, i32
  }
  func.func @transform_7(%arg0: i32) -> (i32, i32) {
    %c0_i32 = arith.constant 0 : i32
    %c0_i32_0 = arith.constant 0 : i32
    %c0_i32_1 = arith.constant 0 : i32
    return %c0_i32, %c0_i32_0 : i32, i32
  }
  func.func @transform_8(%arg0: i32) -> (i32, i32) {
    %c0_i32 = arith.constant 0 : i32
    %c0_i32_0 = arith.constant 0 : i32
    %c0_i32_1 = arith.constant 0 : i32
    return %c0_i32, %c0_i32_0 : i32, i32
  }
  func.func @transform_9(%arg0: i32) -> (i32, i32) {
    %c0_i32 = arith.constant 0 : i32
    %c0_i32_0 = arith.constant 0 : i32
    %c0_i32_1 = arith.constant 0 : i32
    return %c0_i32, %c0_i32_0 : i32, i32
  }
  func.func @transform_10(%arg0: i32) -> (i32, i32) {
    %c0_i32 = arith.constant 0 : i32
    %c0_i32_0 = arith.constant 0 : i32
    %c0_i32_1 = arith.constant 0 : i32
    return %c0_i32, %c0_i32_0 : i32, i32
  }
  func.func @transform_11(%arg0: i32) -> (i32, i32) {
    %c0_i32 = arith.constant 0 : i32
    %c0_i32_0 = arith.constant 0 : i32
    %c0_i32_1 = arith.constant 0 : i32
    return %c0_i32, %c0_i32_0 : i32, i32
  }
  func.func @transform_12(%arg0: i32) -> (i32, i32) {
    %c0_i32 = arith.constant 0 : i32
    %c0_i32_0 = arith.constant 0 : i32
    %c0_i32_1 = arith.constant 0 : i32
    return %c0_i32, %c0_i32_0 : i32, i32
  }
  func.func @transform_13(%arg0: i32) -> (i32, i32) {
    %c0_i32 = arith.constant 0 : i32
    %c0_i32_0 = arith.constant 0 : i32
    %c0_i32_1 = arith.constant 0 : i32
    return %c0_i32, %c0_i32_0 : i32, i32
  }
  func.func @transform_14(%arg0: i32) -> (i32, i32) {
    %c0_i32 = arith.constant 0 : i32
    %c0_i32_0 = arith.constant 0 : i32
    %c0_i32_1 = arith.constant 0 : i32
    return %c0_i32, %c0_i32_0 : i32, i32
  }
  func.func @transform_15(%arg0: i32) -> (i32, i32, i32) {
    %c0_i32 = arith.constant 0 : i32
    %c0_i32_0 = arith.constant 0 : i32
    %c0_i32_1 = arith.constant 0 : i32
    return %arg0, %c0_i32, %c0_i32_0 : i32, i32, i32
  }
}

module attributes {stable_mosaic.version = 11 : i64} {
  func.func @_fapm_combine_kernel(%arg0: i32, %arg1: memref<1x16x16x32xf32, #tpu.memory_space<vmem>>, %arg2: memref<1x16x16x1xf32, #tpu.memory_space<vmem>>, %arg3: memref<1x1x1x32xf32, #tpu.memory_space<vmem>>, %arg4: memref<1x1x1x32xf32, #tpu.memory_space<vmem>>, %arg5: memref<1x1x1x32xf32, #tpu.memory_space<vmem>>, %arg6: memref<1x16x16x32xf32, #tpu.memory_space<vmem>>) attributes {dimension_semantics = [#tpu.dimension_semantics<parallel>], iteration_bounds = array<i64: 2>, scalar_prefetch = 0 : i64, scratch_operands = 0 : i64, tpu.core_type = #tpu.core_type<tc>, window_params = [{transform_indices = @transform_0, window_bounds = array<i64: 1, 16, 16, 32>}, {transform_indices = @transform_1, window_bounds = array<i64: 1, 16, 16, 1>}, {transform_indices = @transform_2, window_bounds = array<i64: 1, 1, 1, 32>}, {pipeline_mode = #tpu.pipeline_mode<synchronous>, transform_indices = @transform_3, window_bounds = array<i64: 1, 1, 1, 32>}, {pipeline_mode = #tpu.pipeline_mode<synchronous>, transform_indices = @transform_4, window_bounds = array<i64: 1, 1, 1, 32>}, {transform_indices = @transform_5, window_bounds = array<i64: 1, 16, 16, 32>}]} {
    %c0 = arith.constant 0 : index
    %c0_0 = arith.constant 0 : index
    %c0_1 = arith.constant 0 : index
    %c0_2 = arith.constant 0 : index
    %0 = vector.load %arg2[%c0, %c0_0, %c0_1, %c0_2] : memref<1x16x16x1xf32, #tpu.memory_space<vmem>>, vector<1x16x16x1xf32>
    %c0_3 = arith.constant 0 : index
    %c0_4 = arith.constant 0 : index
    %c0_5 = arith.constant 0 : index
    %c0_6 = arith.constant 0 : index
    %1 = vector.load %arg4[%c0_3, %c0_4, %c0_5, %c0_6] : memref<1x1x1x32xf32, #tpu.memory_space<vmem>>, vector<1x1x1x32xf32>
    %2 = vector.broadcast %0 : vector<1x16x16x1xf32> to vector<1x16x16x32xf32>
    %3 = vector.broadcast %1 : vector<1x1x1x32xf32> to vector<1x16x16x32xf32>
    %4 = arith.mulf %2, %3 : vector<1x16x16x32xf32>
    %c0_7 = arith.constant 0 : index
    %c0_8 = arith.constant 0 : index
    %c0_9 = arith.constant 0 : index
    %c0_10 = arith.constant 0 : index
    %5 = vector.load %arg5[%c0_7, %c0_8, %c0_9, %c0_10] : memref<1x1x1x32xf32, #tpu.memory_space<vmem>>, vector<1x1x1x32xf32>
    %6 = vector.broadcast %5 : vector<1x1x1x32xf32> to vector<1x16x16x32xf32>
    %7 = arith.addf %4, %6 : vector<1x16x16x32xf32>
    %c0_11 = arith.constant 0 : index
    %c0_12 = arith.constant 0 : index
    %c0_13 = arith.constant 0 : index
    %c0_14 = arith.constant 0 : index
    %8 = vector.load %arg1[%c0_11, %c0_12, %c0_13, %c0_14] : memref<1x16x16x32xf32, #tpu.memory_space<vmem>>, vector<1x16x16x32xf32>
    %9 = arith.mulf %8, %7 : vector<1x16x16x32xf32>
    %c0_15 = arith.constant 0 : index
    %c0_16 = arith.constant 0 : index
    %c0_17 = arith.constant 0 : index
    %c0_18 = arith.constant 0 : index
    %10 = vector.load %arg3[%c0_15, %c0_16, %c0_17, %c0_18] : memref<1x1x1x32xf32, #tpu.memory_space<vmem>>, vector<1x1x1x32xf32>
    %11 = vector.broadcast %10 : vector<1x1x1x32xf32> to vector<1x16x16x32xf32>
    %12 = arith.addf %9, %11 : vector<1x16x16x32xf32>
    %c0_19 = arith.constant 0 : index
    %c0_20 = arith.constant 0 : index
    %c0_21 = arith.constant 0 : index
    %c0_22 = arith.constant 0 : index
    %13 = vector.load %arg6[%c0_19, %c0_20, %c0_21, %c0_22] : memref<1x16x16x32xf32, #tpu.memory_space<vmem>>, vector<1x16x16x32xf32>
    tpu.vector_store %arg6[%c0_19, %c0_20, %c0_21, %c0_22], %12 {strides = array<i32>} : memref<1x16x16x32xf32, #tpu.memory_space<vmem>>, vector<1x16x16x32xf32>,
    return
  }
  func.func @transform_0(%arg0: i32) -> (i32, i32, i32, i32) {
    %c0_i32 = arith.constant 0 : i32
    %c0_i32_0 = arith.constant 0 : i32
    %c0_i32_1 = arith.constant 0 : i32
    %c0_i32_2 = arith.constant 0 : i32
    return %arg0, %c0_i32, %c0_i32_0, %c0_i32_1 : i32, i32, i32, i32
  }
  func.func @transform_1(%arg0: i32) -> (i32, i32, i32, i32) {
    %c0_i32 = arith.constant 0 : i32
    %c0_i32_0 = arith.constant 0 : i32
    %c0_i32_1 = arith.constant 0 : i32
    %c0_i32_2 = arith.constant 0 : i32
    return %arg0, %c0_i32, %c0_i32_0, %c0_i32_1 : i32, i32, i32, i32
  }
  func.func @transform_2(%arg0: i32) -> (i32, i32, i32, i32) {
    %c0_i32 = arith.constant 0 : i32
    %c0_i32_0 = arith.constant 0 : i32
    %c0_i32_1 = arith.constant 0 : i32
    %c0_i32_2 = arith.constant 0 : i32
    return %arg0, %c0_i32, %c0_i32_0, %c0_i32_1 : i32, i32, i32, i32
  }
  func.func @transform_3(%arg0: i32) -> (i32, i32, i32, i32) {
    %c0_i32 = arith.constant 0 : i32
    %c0_i32_0 = arith.constant 0 : i32
    %c0_i32_1 = arith.constant 0 : i32
    %c0_i32_2 = arith.constant 0 : i32
    %c0_i32_3 = arith.constant 0 : i32
    return %c0_i32, %c0_i32_0, %c0_i32_1, %c0_i32_2 : i32, i32, i32, i32
  }
  func.func @transform_4(%arg0: i32) -> (i32, i32, i32, i32) {
    %c0_i32 = arith.constant 0 : i32
    %c0_i32_0 = arith.constant 0 : i32
    %c0_i32_1 = arith.constant 0 : i32
    %c0_i32_2 = arith.constant 0 : i32
    %c0_i32_3 = arith.constant 0 : i32
    return %c0_i32, %c0_i32_0, %c0_i32_1, %c0_i32_2 : i32, i32, i32, i32
  }
  func.func @transform_5(%arg0: i32) -> (i32, i32, i32, i32) {
    %c0_i32 = arith.constant 0 : i32
    %c0_i32_0 = arith.constant 0 : i32
    %c0_i32_1 = arith.constant 0 : i32
    %c0_i32_2 = arith.constant 0 : i32
    return %arg0, %c0_i32, %c0_i32_0, %c0_i32_1 : i32, i32, i32, i32
  }
}

</mosaic_0001>

<bundles_post_ra>
// kernel: fapm_forward.6
= control target key start
LH: loop header
LB: loop body
LE: loop exit
PB: predicated region body
PF: predicated region fallthrough
CT: control target
= control target key end

     0   :  { %v107_v0 = vmov 0.0   ;;  %vm108_vm0 = vmmov 0   ;;  %vm39_vm1 = vcmask 261120   ;;  %s144_s1 = inlined_call_operand.vmem [shape: bf16[32,32], index: 1, kind: input, shape index: {}]   ;;  %s145_s0 = inlined_call_operand.vmem [shape: bf16[8,32], index: 0, kind: input, shape index: {}]   ;;  %s146_s2 = inlined_call_operand.vmem [shape: f32[1,32], index: 2, kind: input, shape index: {}]   ;;  %s147_s3 = inlined_call_operand.vmem [shape: f32[8,32], index: 3, kind: output, shape index: {}]  }
   0x1   :  { %95 = vmatprep.subr.bf16.mxu0 %v107_v0  ;;  %v105_v1 = vld [vmem:[%s144_s1 + $0x8] sm:$0xff]   ;;  %99 = vmatprep.mubr.msk.bf16.mxu0 %vm108_vm0, %v107_v0  ;;  %v106_v2 = vld [vmem:[%s144_s1] sm:$0xff]  }
   0x2   :  { %96 = vmatpush3.bf16.msra.mxu0 %v105_v1  ;;  %v15_v3 = vld [vmem:[%s145_s0] sm:$0xf] }
   0x3   :  { %97 = vmatprep.subr.bf16.mxu0 %v107_v0  ;;  %v88_v4 = vld [vmem:[%s146_s2] ss:$0 sm:$0xff] }
   0x6   :  { %98 = vmatpush3.bf16.msra.mxu0 %v106_v2 }
   0x9   :  { %100 = vmatmul.mubr.msk.bf16.vlgmr.msra.gmra.mxu0 %vm39_vm1, %v15_v3 }
  0xc9   :  { %v77_v5 = vpop.f32.mrf.mxu0 }
  0xca   :  { %v78_v6 = vadd.f32 %v88_v4, %v77_v5 }
  0xcb   :  { %v101_v7 = vpop.f32.mrf.mxu0 }
  0xcc   :  { %83 = vst.msk [vmem:[%s147_s3] sm:$0xff] %vm39_vm1, %v78_v6 }
  0xcd   :  { %v80_v8 = vpop.f32.mrf.mxu0 }
  0xcf   :  { %v102_v9 = vpop.f32.mrf.mxu0 }

// kernel: fapm_forward.4
= control target key start
LH: loop header
LB: loop body
LE: loop exit
PB: predicated region body
PF: predicated region fallthrough
CT: control target
= control target key end

     0   :  { %s414_s14 = smov 0   ;;  %s467_s0 = inlined_call_operand.vmem [shape: bf16[128,224], index: 0, kind: input, shape index: {}]   ;;  %s468_s1 = inlined_call_operand.vmem [shape: bf16[1,224], index: 1, kind: input, shape index: {}]   ;;  %s469_s2 = inlined_call_operand.<no memory space> [shape: f32[1,1], index: 2, kind: input, shape index: {}]   ;;  %s470_s3 = inlined_call_operand.vmem [shape: f32[128,1], index: 3, kind: output, shape index: {}]  }
   0x1   :  { %v8_v0 = vstv %s469_s2 }
   0x2   :  { %9 = vst [vmem:[#allocation2] sm:$0x1] %v8_v0 }
   0x3 LB: > { %s361_s15 = sadd.s32 4294967295, %s389_s14   ;;  %p365_p0 = scmp.ge.s32.totalorder %s389_s14, 1  ;;  %s389_s14 = sphi %s414_s14, %s15_s14  }
   0x4   : > { %p141_p1 = scmp.lt.s32.totalorder %s389_s14, 3 }
   0x6   : > { %p142_p2 = pnand %p365_p0, %p141_p1 }
   0x7   : > { %s366_s16 = sshll.u32 (!%p142_p2), %s361_s15, 3 }
   0x8   : > { %145 = sbr.rel (%p142_p2) target bundleno = 183 (0xb7), region = 32  ;;  %p167_p3 = scmp.lt.s32.totalorder (!%p142_p2), %s366_s16, 15 }
   0xd   : > { %v203_v1 = vld [vmem:[%s468_s1] sm:$0x3]  ;;  %v206_v2 = vlaneseq  ;;  %s472_s16 = smov (!%p167_p3, %s366_s16), 15  ;;  %vm240_vm0 = vcmask 785408   ;;  %vm296_vm1 = vcmask 7168  }
   0xe   : > { %v204_v3 = vunpack.c.l.bf16 %v203_v1  ;;  %s374_s2 = sshll.u32 %s472_s16, 3 }
   0xf   : > { %v207_v4 = vshrl.u32 %v206_v2, 7  ;;  %s433_s21 = scalar_lea.vmem %s467_s0, %s374_s2  ;;  %s177_s24 = scalar_lea.vmem %s470_s3, %s374_s2 }
  0x10   : > { %v181_v9 = vld [vmem:[%s433_s21 + $0x10] sm:$0xff]  ;;  %v179_v10 = vld [vmem:[%s433_s21] sm:$0xff]  ;;  %v182_v11 = vld [vmem:[%s433_s21 + $0x18] sm:$0xff] }
  0x11   : > { %v208_v5 = vsub.s32 0, %v207_v4  ;;  %v212_v6 = vsub.s32 2, %v207_v4  ;;  %v191_v12 = vunpack.c.l.bf16 %v181_v9  ;;  %v192_v13 = vunpack.c.h.bf16 %v181_v9  ;;  %v180_v16 = vld [vmem:[%s433_s21 + $0x8] sm:$0xff]  ;;  %v183_v34 = vld [vmem:[%s433_s21 + $0x20] sm:$0xff]  ;;  %v186_v39 = vld [vmem:[%s433_s21 + $0x38] sm:$0xff] }
  0x12   : > { %v187_v17 = vunpack.c.l.bf16 %v179_v10  ;;  %v188_v18 = vunpack.c.h.bf16 %v179_v10  ;;  %v193_v19 = vunpack.c.l.bf16 %v182_v11  ;;  %v194_v20 = vunpack.c.h.bf16 %v182_v11  ;;  %v184_v21 = vld [vmem:[%s433_s21 + $0x28] sm:$0xff]  ;;  %v185_v40 = vld [vmem:[%s433_s21 + $0x30] sm:$0xff] }
  0x13   : > { %v209_v7 = vrot.slane %v204_v3, %v208_v5  ;;  %v213_v8 = vrot.slane %v204_v3, %v212_v6  ;;  %v189_v24 = vunpack.c.l.bf16 %v180_v16  ;;  %v190_v25 = vunpack.c.h.bf16 %v180_v16  ;;  %v371_v3 = vld [vmem:[#allocation2] ss:$0 sm:$0xff] }
  0x14   : > { %v197_v33 = vunpack.c.l.bf16 %v184_v21  ;;  %v198_v38 = vunpack.c.h.bf16 %v184_v21  ;;  %v195_v47 = vunpack.c.l.bf16 %v183_v34  ;;  %v196_v48 = vunpack.c.h.bf16 %v183_v34 }
  0x15   : > { %v219_v14 = vrot.slane %v209_v7, %v208_v5  ;;  %v223_v15 = vrot.slane %v213_v8, %v208_v5  ;;  %v201_v49 = vunpack.c.l.bf16 %v186_v39  ;;  %v202_v50 = vunpack.c.h.bf16 %v186_v39 }
  0x16   : > { %v199_v51 = vunpack.c.l.bf16 %v185_v40  ;;  %v200_v52 = vunpack.c.h.bf16 %v185_v40 }
  0x17   : > { %v228_v22 = vmul.f32 %v219_v14, %v191_v12  ;;  %v229_v23 = vmul.f32 %v223_v15, %v192_v13  ;;  %v224_v26 = vmul.f32 %v219_v14, %v187_v17  ;;  %v225_v27 = vmul.f32 %v223_v15, %v188_v18 }
  0x18   : > { %v230_v28 = vmul.f32 %v219_v14, %v193_v19  ;;  %v231_v29 = vmul.f32 %v223_v15, %v194_v20  ;;  %v226_v31 = vmul.f32 %v219_v14, %v189_v24  ;;  %v227_v32 = vmul.f32 %v223_v15, %v190_v25 }
  0x19   : > { %v249_v30 = vsel %vm240_vm0, %v229_v23, 0.0  ;;  %v241_v36 = vsel %vm240_vm0, %v225_v27, 0.0  ;;  %v234_v44 = vmul.f32 %v219_v14, %v197_v33  ;;  %v235_v46 = vmul.f32 %v223_v15, %v198_v38 }
  0x1a   : > { %v250_v35 = vadd.f32 %v249_v30, %v228_v22  ;;  %v253_v37 = vsel %vm240_vm0, %v231_v29, 0.0  ;;  %v242_v41 = vadd.f32 %v241_v36, %v224_v26  ;;  %v245_v43 = vsel %vm240_vm0, %v227_v32, 0.0 }
  0x1b   : > { %v254_v42 = vadd.f32 %v253_v37, %v230_v28  ;;  %v246_v45 = vadd.f32 %v245_v43, %v226_v31  ;;  %v261_v53 = vsel %vm240_vm0, %v235_v46, 0.0  ;;  %v232_v54 = vmul.f32 %v219_v14, %v195_v47 }
  0x1c   : > { %251 = vadd.xlane.f32.xlu1 %v250_v35  ;;  %243 = vadd.xlane.f32.xlu0 %v242_v41  ;;  %v233_v55 = vmul.f32 %v223_v15, %v196_v48  ;;  %v239_v56 = vmul.f32 %v223_v15, %v202_v50  ;;  %v262_v57 = vadd.f32 %v261_v53, %v234_v44 }
  0x1d   : > { %v238_v59 = vmul.f32 %v219_v14, %v201_v49  ;;  %v237_v60 = vmul.f32 %v223_v15, %v200_v52  ;;  %v236_v63 = vmul.f32 %v219_v14, %v199_v51 }
  0x1e   : > { %v257_v58 = vsel %vm240_vm0, %v233_v55, 0.0  ;;  %v269_v62 = vsel %vm240_vm0, %v239_v56, 0.0 }
  0x1f   : > { %v258_v61 = vadd.f32 %v257_v58, %v232_v54  ;;  %v265_v0 = vsel %vm240_vm0, %v237_v60, 0.0  ;;  %v270_v1 = vadd.f32 %v269_v62, %v238_v59 }
  0x20   : > { %255 = vadd.xlane.f32.xlu1 %v254_v42  ;;  %247 = vadd.xlane.f32.xlu0 %v246_v45  ;;  %v266_v2 = vadd.f32 %v265_v0, %v236_v63 }
  0x24   : > { %263 = vadd.xlane.f32.xlu1 %v262_v57  ;;  %259 = vadd.xlane.f32.xlu0 %v258_v61 }
  0x28   : > { %271 = vadd.xlane.f32.xlu1 %v270_v1  ;;  %267 = vadd.xlane.f32.xlu0 %v266_v2 }
  0xa5   : > { %v252_v4 = vpop.xlane.xlu1 %251  ;;  %v244_v6 = vpop.xlane.xlu0 %243 }
  0xa6   : > { %v282_v5 = vadd.f32 %v371_v3, %v252_v4  ;;  %v280_v7 = vadd.f32 %v371_v3, %v244_v6 }
  0xa8   : > { %v290_v8 = vmax.f32 %v282_v5, 0.0  ;;  %v288_v9 = vmax.f32 %v280_v7, 0.0 }
  0xa9   : > { %v256_v10 = vpop.xlane.xlu1 %255  ;;  %v248_v12 = vpop.xlane.xlu0 %247 }
  0xaa   : > { %299 = vst.msk [vmem:[%s177_s24 + $0x10] sm:$0xff] %vm296_vm1, %v290_v8  ;;  %v283_v11 = vadd.f32 %v371_v3, %v256_v10  ;;  %297 = vst.msk [vmem:[%s177_s24] sm:$0xff] %vm296_vm1, %v288_v9  ;;  %v281_v13 = vadd.f32 %v371_v3, %v248_v12 }
  0xac   : > { %v291_v14 = vmax.f32 %v283_v11, 0.0  ;;  %v289_v15 = vmax.f32 %v281_v13, 0.0 }
  0xad   : > { %v264_v16 = vpop.xlane.xlu1 %263  ;;  %v260_v18 = vpop.xlane.xlu0 %259 }
  0xae   : > { %300 = vst.msk [vmem:[%s177_s24 + $0x18] sm:$0xff] %vm296_vm1, %v291_v14  ;;  %v285_v17 = vadd.f32 %v371_v3, %v264_v16  ;;  %298 = vst.msk [vmem:[%s177_s24 + $0x8] sm:$0xff] %vm296_vm1, %v289_v15  ;;  %v284_v19 = vadd.f32 %v371_v3, %v260_v18 }
  0xb0   : > { %v293_v20 = vmax.f32 %v285_v17, 0.0  ;;  %v292_v21 = vmax.f32 %v284_v19, 0.0 }
  0xb1   : > { %v272_v22 = vpop.xlane.xlu1 %271  ;;  %v268_v24 = vpop.xlane.xlu0 %267 }
  0xb2   : > { %302 = vst.msk [vmem:[%s177_s24 + $0x28] sm:$0xff] %vm296_vm1, %v293_v20  ;;  %v287_v23 = vadd.f32 %v371_v3, %v272_v22  ;;  %301 = vst.msk [vmem:[%s177_s24 + $0x20] sm:$0xff] %vm296_vm1, %v292_v21  ;;  %v286_v25 = vadd.f32 %v371_v3, %v268_v24 }
  0xb4   : > { %v295_v26 = vmax.f32 %v287_v23, 0.0  ;;  %v294_v27 = vmax.f32 %v286_v25, 0.0 }
  0xb6   : > { %304 = vst.msk [vmem:[%s177_s24 + $0x38] sm:$0xff] %vm296_vm1, %v295_v26  ;;  %303 = vst.msk [vmem:[%s177_s24 + $0x30] sm:$0xff] %vm296_vm1, %v294_v27 }
  0xb7 PF: > { %s15_s14 = sadd.s32 1, %s389_s14  }
  0xb8   : > { %p12_p4 = scmp.ge.s32.totalorder %s15_s14, 4  }
  0xba   :  { %14 = sbr.rel (!%p12_p4) target bundleno = 3 (0x3), region = 62 }

// kernel: fapm_forward.7
= control target key start
LH: loop header
LB: loop body
LE: loop exit
PB: predicated region body
PF: predicated region fallthrough
CT: control target
= control target key end

     0   :  { %10 = vsyncpa [#allocation3], 0  ;;  %s1283_s0 = inlined_call_operand.vmem [shape: f32[2,16,16,32], index: 0, kind: input, shape index: {}]   ;;  %s1284_s1 = inlined_call_operand.vmem [shape: f32[2,16,16,1], index: 1, kind: input, shape index: {}]   ;;  %s1285_s2 = inlined_call_operand.vmem [shape: f32[2,1,1,32], index: 2, kind: input, shape index: {}]   ;;  %s1286_s3 = inlined_call_operand.vmem [shape: f32[1,1,1,32], index: 3, kind: input, shape index: {}]   ;;  %s1287_s4 = inlined_call_operand.vmem [shape: f32[1,1,1,32], index: 4, kind: input, shape index: {}]   ;;  %s1288_s5 = inlined_call_operand.hbm [shape: f32[2,16,16,32], index: 5, kind: output, shape index: {}]  }
   0x1   :  { %12 = vsyncpa [#allocation3 + $0x1], 0  ;;  %s920_s18 = smov 0   ;;  %s922_s19 = smov 0  }
   0x2   :  { %s924_s20 = smov 0   ;;  %s926_s21 = smov 0  }
   0x3 LB: > { %s941_s22 = sadd.s32 4294967295, %s884_s21   ;;  %s760_s23 = sadd.s32 4294967294, %s884_s21   ;;  %s884_s21 = sphi %s926_s21, %s1294_s21   ;;  %s880_s20 = sphi %s924_s20, %s1293_s20   ;;  %s876_s19 = sphi %s922_s19, %s1292_s19   ;;  %s872_s18 = sphi %s920_s18, %s1291_s18  }
   0x4   : > { %s945_s24 = sadd.s32 1, %s884_s21   ;;  %s145_s25 = sadd.s32 1, %s880_s20 }
   0x5   : > { %s142_s26 = ssub.s32 %s884_s21, %s945_s24  ;;  %p155_p0 = scmp.ne.s32.totalorder %s880_s20, %s876_s19 }
   0x6   : > { %p143_p1 = scmp.eq.s32.totalorder %s142_s26, 0  ;;  %p156_p2 = scmp.eq.s32.totalorder %s941_s22, 1 }
   0x7   : > { %p161_p3 = scmp.ne.s32.totalorder %s876_s19, %s872_s18  ;;  %p162_p4 = scmp.eq.s32.totalorder %s760_s23, 1 }
   0x8   : > { %s956_s27 = scalar_select %p143_p1, %s880_s20, %s145_s25  }
   0x9   : > { %p958_p5 = por %p156_p2, %p155_p0  ;;  %p962_p6 = por %p162_p4, %p161_p3 }
   0xa   : > { %p763_p7 = scmp.ge.s32.totalorder %s884_s21, 1  ;;  %p208_p8 = scmp.lt.s32.totalorder %s884_s21, 3 }
   0xc   : > { %p209_p9 = pnand %p763_p7, %p208_p8 }
   0xd   : > { %p244_p10 = scmp.lt.s32.totalorder (!%p209_p9), %s941_s22, 1  ;;  %s241_s17 = sand.u32 (!%p209_p9), 1, %s876_s19  }
   0xe   : > { %212 = sbr.rel (%p209_p9) target bundleno = 230 (0xe6), region = 40  ;;  %s779_s7 = sshll.u32 (!%p209_p9), %s941_s22, 12 }
   0xf   : > { %s1231_s11 = scalar_lea.hbm (!%p209_p9), %s1288_s5, %s779_s7  ;;  %s887_s13 = smov (!%p209_p9), [#allocation2]  }
  0x13   : > { %v886_v0 = vmov 0   ;;  %s970_s30 = scalar_select %p244_p10, %s941_s22, 1  ;;  %v1015_v33 = vld [vmem:[%s1286_s3] ss:$0 sm:$0xff]  ;;  %vm630_vm0 = vcmask 261120  }
  0x14   : > { %823 = vset.pattern.permute.xlu1 %v886_v0  ;;  %822 = vset.pattern.permute.xlu0 %v886_v0  ;;  %v1027_v34 = vld [vmem:[%s1287_s4] ss:$0 sm:$0xff]  ;;  %s1243_s22 = scalar_lea.sflag [#allocation3], %s241_s17 }
  0x15   : > { %s777_s6 = sshll.u32 %s970_s30, 8  ;;  %s256_s26 = scalar_lea.vmem %s1285_s2, %s970_s30 }
  0x16   : > { %s978_s9 = scalar_lea.vmem %s1284_s1, %s777_s6  ;;  %s1022_s14 = scalar_lea.vmem %s1283_s0, %s777_s6  ;;  %v1042_v43 = vld [vmem:[%s256_s26] ss:$0 sm:$0xff] }
  0x17   : > { %v259_v1 = vld [vmem:[%s978_s9 + $0x10] sm:$0xff]  ;;  %v257_v2 = vld [vmem:[%s978_s9] sm:$0xff]  ;;  %v260_v3 = vld [vmem:[%s978_s9 + $0x18] sm:$0xff]  ;;  %s764_s6 = sshll.u32 %s241_s17, 8 }
  0x18   : > { %302 = vperm.xlu1 %823, %v259_v1   ;;  %292 = vperm.xlu0 %822, %v257_v2   ;;  %v258_v4 = vld [vmem:[%s978_s9 + $0x8] sm:$0xff]  ;;  %v261_v6 = vld [vmem:[%s978_s9 + $0x20] sm:$0xff]  ;;  %v264_v7 = vld [vmem:[%s978_s9 + $0x38] sm:$0xff]  ;;  %s1052_s30 = scalar_lea.vmem [#allocation2], %s764_s6 }
  0x19   : > { %v262_v5 = vld [vmem:[%s978_s9 + $0x28] sm:$0xff]  ;;  %v263_v8 = vld [vmem:[%s978_s9 + $0x30] sm:$0xff]  ;;  %v265_v10 = vld [vmem:[%s978_s9 + $0x40] sm:$0xff]  ;;  %s677_s8 = sshll.u32 %s1052_s30, 4  ;;  %s1233_s8 = int_to_ptr.vmem [resolvable:$true] %s677_s8 }
  0x1a   : > { %v266_v9 = vld [vmem:[%s978_s9 + $0x48] sm:$0xff]  ;;  %v268_v11 = vld [vmem:[%s978_s9 + $0x58] sm:$0xff]  ;;  %v267_v12 = vld [vmem:[%s978_s9 + $0x50] sm:$0xff]  ;;  %s824_s12 = scalar_lea.vmem %s1233_s8, 4096 }
  0x1b   : > { %v270_v13 = vld [vmem:[%s978_s9 + $0x68] sm:$0xff]  ;;  %v269_v14 = vld [vmem:[%s978_s9 + $0x60] sm:$0xff]  ;;  %v272_v15 = vld [vmem:[%s978_s9 + $0x78] sm:$0xff]  ;;  %p825_p11 = scmp.ne.s32.totalorder %s1233_s8, %s824_s12 }
  0x1c   : > { %307 = vperm.xlu1 %823, %v260_v3   ;;  %297 = vperm.xlu0 %822, %v258_v4   ;;  %v271_v16 = vld [vmem:[%s978_s9 + $0x70] sm:$0xff]  ;;  %v274_v17 = vld [vmem:[%s978_s9 + $0x88] sm:$0xff]  ;;  %v273_v18 = vld [vmem:[%s978_s9 + $0x80] sm:$0xff] }
  0x1d   : > { %v276_v19 = vld [vmem:[%s978_s9 + $0x98] sm:$0xff]  ;;  %v275_v20 = vld [vmem:[%s978_s9 + $0x90] sm:$0xff]  ;;  %v278_v21 = vld [vmem:[%s978_s9 + $0xa8] sm:$0xff]  ;;  %p826_p12 = pnand %p825_p11, %p958_p5 }
  0x1e   : > { %v277_v22 = vld [vmem:[%s978_s9 + $0xa0] sm:$0xff]  ;;  %v280_v23 = vld [vmem:[%s978_s9 + $0xb8] sm:$0xff]  ;;  %v279_v24 = vld [vmem:[%s978_s9 + $0xb0] sm:$0xff] }
  0x1f   : > { %v282_v25 = vld [vmem:[%s978_s9 + $0xc8] sm:$0xff]  ;;  %v281_v26 = vld [vmem:[%s978_s9 + $0xc0] sm:$0xff]  ;;  %v284_v27 = vld [vmem:[%s978_s9 + $0xd8] sm:$0xff]  ;;  %p827_p13 = pneg %p826_p12 }
  0x20   : > { %317 = vperm.xlu1 %823, %v262_v5   ;;  %312 = vperm.xlu0 %822, %v261_v6   ;;  %v283_v28 = vld [vmem:[%s978_s9 + $0xd0] sm:$0xff]  ;;  %v286_v29 = vld [vmem:[%s978_s9 + $0xe8] sm:$0xff]  ;;  %v285_v30 = vld [vmem:[%s978_s9 + $0xe0] sm:$0xff] }
  0x21   : > { %v288_v31 = vld [vmem:[%s978_s9 + $0xf8] sm:$0xff]  ;;  %v287_v32 = vld [vmem:[%s978_s9 + $0xf0] sm:$0xff]  ;;  %v527_v40 = vld [vmem:[%s1022_s14] sm:$0xff] }
  0x22   : > { %v529_v39 = vld [vmem:[%s1022_s14 + $0x10] sm:$0xff]  ;;  %v530_v50 = vld [vmem:[%s1022_s14 + $0x18] sm:$0xff]  ;;  %v528_v51 = vld [vmem:[%s1022_s14 + $0x8] sm:$0xff] }
  0x23   : > { %v532_v62 = vld [vmem:[%s1022_s14 + $0x28] sm:$0xff]  ;;  %v531_v63 = vld [vmem:[%s1022_s14 + $0x20] sm:$0xff] }
  0x24   : > { %327 = vperm.xlu1 %823, %v264_v7   ;;  %322 = vperm.xlu0 %822, %v263_v8  }
  0x28   : > { %337 = vperm.xlu1 %823, %v266_v9   ;;  %332 = vperm.xlu0 %822, %v265_v10   ;;  %v534_v10 = vld [vmem:[%s1022_s14 + $0x38] sm:$0xff] }
  0x2c   : > { %347 = vperm.xlu1 %823, %v268_v11   ;;  %342 = vperm.xlu0 %822, %v267_v12   ;;  %v533_v11 = vld [vmem:[%s1022_s14 + $0x30] sm:$0xff] }
  0x30   : > { %357 = vperm.xlu1 %823, %v270_v13   ;;  %352 = vperm.xlu0 %822, %v269_v14  }
  0x34   : > { %367 = vperm.xlu1 %823, %v272_v15   ;;  %362 = vperm.xlu0 %822, %v271_v16  }
  0x38   : > { %377 = vperm.xlu1 %823, %v274_v17   ;;  %372 = vperm.xlu0 %822, %v273_v18  }
  0x3c   : > { %387 = vperm.xlu1 %823, %v276_v19   ;;  %382 = vperm.xlu0 %822, %v275_v20  }
  0x40   : > { %397 = vperm.xlu1 %823, %v278_v21   ;;  %392 = vperm.xlu0 %822, %v277_v22   ;;  %v536_v22 = vld [vmem:[%s1022_s14 + $0x48] sm:$0xff] }
  0x44   : > { %407 = vperm.xlu1 %823, %v280_v23   ;;  %402 = vperm.xlu0 %822, %v279_v24   ;;  %v535_v23 = vld [vmem:[%s1022_s14 + $0x40] sm:$0xff] }
  0x48   : > { %417 = vperm.xlu1 %823, %v282_v25   ;;  %412 = vperm.xlu0 %822, %v281_v26  }
  0x4c   : > { %427 = vperm.xlu1 %823, %v284_v27   ;;  %422 = vperm.xlu0 %822, %v283_v28  }
  0x50   : > { %437 = vperm.xlu1 %823, %v286_v29   ;;  %432 = vperm.xlu0 %822, %v285_v30  }
  0x54   : > { %447 = vperm.xlu1 %823, %v288_v31   ;;  %442 = vperm.xlu0 %822, %v287_v32  }
  0x93   : > { %v303_v35 = vpop.permute.xlu1 %302  ;;  %v293_v36 = vpop.permute.xlu0 %292 }
  0x94   : > { %v458_v37 = vmul.f32 %v1015_v33, %v303_v35  ;;  %v456_v38 = vmul.f32 %v1015_v33, %v293_v36  ;;  %v538_v36 = vld [vmem:[%s1022_s14 + $0x58] sm:$0xff] }
  0x96   : > { %v497_v41 = vadd.f32 %v1027_v34, %v458_v37  ;;  %v495_v42 = vadd.f32 %v1027_v34, %v456_v38  ;;  %v537_v37 = vld [vmem:[%s1022_s14 + $0x50] sm:$0xff] }
  0x97   : > { %v308_v44 = vpop.permute.xlu1 %307  ;;  %v298_v45 = vpop.permute.xlu0 %297 }
  0x98   : > { %v561_v46 = vmul.f32 %v529_v39, %v497_v41  ;;  %v559_v47 = vmul.f32 %v527_v40, %v495_v42  ;;  %v459_v48 = vmul.f32 %v1015_v33, %v308_v44  ;;  %v457_v49 = vmul.f32 %v1015_v33, %v298_v45 }
  0x9a   : > { %v600_v52 = vadd.f32 %v1042_v43, %v561_v46  ;;  %v598_v53 = vadd.f32 %v1042_v43, %v559_v47  ;;  %v498_v54 = vadd.f32 %v1027_v34, %v459_v48  ;;  %v496_v55 = vadd.f32 %v1027_v34, %v457_v49  ;;  %v540_v49 = vld [vmem:[%s1022_s14 + $0x68] sm:$0xff] }
  0x9b   : > { %v318_v56 = vpop.permute.xlu1 %317  ;;  %v313_v57 = vpop.permute.xlu0 %312 }
  0x9c   : > { %633 = vst.msk [vmem:[%s1052_s30 + $0x10] sm:$0xff] %vm630_vm0, %v600_v52  ;;  %631 = vst.msk [vmem:[%s1052_s30] sm:$0xff] %vm630_vm0, %v598_v53  ;;  %v562_v58 = vmul.f32 %v530_v50, %v498_v54  ;;  %v560_v59 = vmul.f32 %v528_v51, %v496_v55  ;;  %v461_v60 = vmul.f32 %v1015_v33, %v318_v56  ;;  %v539_v50 = vld [vmem:[%s1022_s14 + $0x60] sm:$0xff] }
  0x9d   : > { %v460_v61 = vmul.f32 %v1015_v33, %v313_v57 }
  0x9e   : > { %v601_v0 = vadd.f32 %v1042_v43, %v562_v58  ;;  %v599_v1 = vadd.f32 %v1042_v43, %v560_v59  ;;  %v500_v2 = vadd.f32 %v1027_v34, %v461_v60 }
  0x9f   : > { %v499_v3 = vadd.f32 %v1027_v34, %v460_v61  ;;  %v328_v4 = vpop.permute.xlu1 %327  ;;  %v323_v5 = vpop.permute.xlu0 %322  ;;  %v542_v61 = vld [vmem:[%s1022_s14 + $0x78] sm:$0xff] }
  0xa0   : > { %634 = vst.msk [vmem:[%s1052_s30 + $0x18] sm:$0xff] %vm630_vm0, %v601_v0  ;;  %632 = vst.msk [vmem:[%s1052_s30 + $0x8] sm:$0xff] %vm630_vm0, %v599_v1  ;;  %v564_v6 = vmul.f32 %v532_v62, %v500_v2  ;;  %v463_v8 = vmul.f32 %v1015_v33, %v328_v4  ;;  %v462_v9 = vmul.f32 %v1015_v33, %v323_v5  ;;  %v541_v62 = vld [vmem:[%s1022_s14 + $0x70] sm:$0xff] }
  0xa1   : > { %v563_v7 = vmul.f32 %v531_v63, %v499_v3 }
  0xa2   : > { %v603_v12 = vadd.f32 %v1042_v43, %v564_v6  ;;  %v502_v14 = vadd.f32 %v1027_v34, %v463_v8  ;;  %v501_v15 = vadd.f32 %v1027_v34, %v462_v9  ;;  %v544_v9 = vld [vmem:[%s1022_s14 + $0x88] sm:$0xff] }
  0xa3   : > { %v602_v13 = vadd.f32 %v1042_v43, %v563_v7  ;;  %v338_v16 = vpop.permute.xlu1 %337  ;;  %v333_v17 = vpop.permute.xlu0 %332 }
  0xa4   : > { %636 = vst.msk [vmem:[%s1052_s30 + $0x28] sm:$0xff] %vm630_vm0, %v603_v12  ;;  %v566_v18 = vmul.f32 %v534_v10, %v502_v14  ;;  %v565_v19 = vmul.f32 %v533_v11, %v501_v15  ;;  %v465_v20 = vmul.f32 %v1015_v33, %v338_v16  ;;  %v464_v21 = vmul.f32 %v1015_v33, %v333_v17  ;;  %v543_v10 = vld [vmem:[%s1022_s14 + $0x80] sm:$0xff] }
  0xa5   : > { %635 = vst.msk [vmem:[%s1052_s30 + $0x20] sm:$0xff] %vm630_vm0, %v602_v13 }
  0xa6   : > { %v605_v24 = vadd.f32 %v1042_v43, %v566_v18  ;;  %v604_v25 = vadd.f32 %v1042_v43, %v565_v19  ;;  %v504_v26 = vadd.f32 %v1027_v34, %v465_v20  ;;  %v503_v27 = vadd.f32 %v1027_v34, %v464_v21  ;;  %v546_v21 = vld [vmem:[%s1022_s14 + $0x98] sm:$0xff] }
  0xa7   : > { %v348_v28 = vpop.permute.xlu1 %347  ;;  %v343_v29 = vpop.permute.xlu0 %342 }
  0xa8   : > { %638 = vst.msk [vmem:[%s1052_s30 + $0x38] sm:$0xff] %vm630_vm0, %v605_v24  ;;  %637 = vst.msk [vmem:[%s1052_s30 + $0x30] sm:$0xff] %vm630_vm0, %v604_v25  ;;  %v568_v30 = vmul.f32 %v536_v22, %v504_v26  ;;  %v567_v31 = vmul.f32 %v535_v23, %v503_v27  ;;  %v467_v32 = vmul.f32 %v1015_v33, %v348_v28  ;;  %v545_v22 = vld [vmem:[%s1022_s14 + $0x90] sm:$0xff] }
  0xa9   : > { %v466_v35 = vmul.f32 %v1015_v33, %v343_v29 }
  0xaa   : > { %v607_v38 = vadd.f32 %v1042_v43, %v568_v30  ;;  %v606_v39 = vadd.f32 %v1042_v43, %v567_v31  ;;  %v506_v40 = vadd.f32 %v1027_v34, %v467_v32 }
  0xab   : > { %v505_v41 = vadd.f32 %v1027_v34, %v466_v35  ;;  %v358_v42 = vpop.permute.xlu1 %357  ;;  %v353_v44 = vpop.permute.xlu0 %352  ;;  %v548_v35 = vld [vmem:[%s1022_s14 + $0xa8] sm:$0xff] }
  0xac   : > { %640 = vst.msk [vmem:[%s1052_s30 + $0x48] sm:$0xff] %vm630_vm0, %v607_v38  ;;  %639 = vst.msk [vmem:[%s1052_s30 + $0x40] sm:$0xff] %vm630_vm0, %v606_v39  ;;  %v570_v45 = vmul.f32 %v538_v36, %v506_v40  ;;  %v469_v47 = vmul.f32 %v1015_v33, %v358_v42  ;;  %v468_v48 = vmul.f32 %v1015_v33, %v353_v44  ;;  %v547_v36 = vld [vmem:[%s1022_s14 + $0xa0] sm:$0xff] }
  0xad   : > { %v569_v46 = vmul.f32 %v537_v37, %v505_v41 }
  0xae   : > { %v609_v51 = vadd.f32 %v1042_v43, %v570_v45  ;;  %v508_v53 = vadd.f32 %v1027_v34, %v469_v47  ;;  %v507_v54 = vadd.f32 %v1027_v34, %v468_v48  ;;  %v550_v48 = vld [vmem:[%s1022_s14 + $0xb8] sm:$0xff] }
  0xaf   : > { %v608_v52 = vadd.f32 %v1042_v43, %v569_v46  ;;  %v368_v55 = vpop.permute.xlu1 %367  ;;  %v363_v56 = vpop.permute.xlu0 %362 }
  0xb0   : > { %642 = vst.msk [vmem:[%s1052_s30 + $0x58] sm:$0xff] %vm630_vm0, %v609_v51  ;;  %v572_v57 = vmul.f32 %v540_v49, %v508_v53  ;;  %v571_v58 = vmul.f32 %v539_v50, %v507_v54  ;;  %v471_v59 = vmul.f32 %v1015_v33, %v368_v55  ;;  %v470_v60 = vmul.f32 %v1015_v33, %v363_v56  ;;  %v549_v49 = vld [vmem:[%s1022_s14 + $0xb0] sm:$0xff] }
  0xb1   : > { %641 = vst.msk [vmem:[%s1052_s30 + $0x50] sm:$0xff] %vm630_vm0, %v608_v52 }
  0xb2   : > { %v611_v63 = vadd.f32 %v1042_v43, %v572_v57  ;;  %v610_v0 = vadd.f32 %v1042_v43, %v571_v58  ;;  %v510_v1 = vadd.f32 %v1027_v34, %v471_v59  ;;  %v509_v2 = vadd.f32 %v1027_v34, %v470_v60  ;;  %v552_v60 = vld [vmem:[%s1022_s14 + $0xc8] sm:$0xff] }
  0xb3   : > { %v378_v3 = vpop.permute.xlu1 %377  ;;  %v373_v4 = vpop.permute.xlu0 %372 }
  0xb4   : > { %644 = vst.msk [vmem:[%s1052_s30 + $0x68] sm:$0xff] %vm630_vm0, %v611_v63  ;;  %643 = vst.msk [vmem:[%s1052_s30 + $0x60] sm:$0xff] %vm630_vm0, %v610_v0  ;;  %v574_v5 = vmul.f32 %v542_v61, %v510_v1  ;;  %v573_v6 = vmul.f32 %v541_v62, %v509_v2  ;;  %v473_v7 = vmul.f32 %v1015_v33, %v378_v3  ;;  %v551_v61 = vld [vmem:[%s1022_s14 + $0xc0] sm:$0xff] }
  0xb5   : > { %v472_v8 = vmul.f32 %v1015_v33, %v373_v4 }
  0xb6   : > { %v613_v11 = vadd.f32 %v1042_v43, %v574_v5  ;;  %v612_v12 = vadd.f32 %v1042_v43, %v573_v6  ;;  %v512_v13 = vadd.f32 %v1027_v34, %v473_v7 }
  0xb7   : > { %v511_v14 = vadd.f32 %v1027_v34, %v472_v8  ;;  %v388_v15 = vpop.permute.xlu1 %387  ;;  %v383_v16 = vpop.permute.xlu0 %382  ;;  %v554_v8 = vld [vmem:[%s1022_s14 + $0xd8] sm:$0xff] }
  0xb8   : > { %646 = vst.msk [vmem:[%s1052_s30 + $0x78] sm:$0xff] %vm630_vm0, %v613_v11  ;;  %645 = vst.msk [vmem:[%s1052_s30 + $0x70] sm:$0xff] %vm630_vm0, %v612_v12  ;;  %v576_v17 = vmul.f32 %v544_v9, %v512_v13  ;;  %v475_v19 = vmul.f32 %v1015_v33, %v388_v15  ;;  %v474_v20 = vmul.f32 %v1015_v33, %v383_v16  ;;  %v553_v9 = vld [vmem:[%s1022_s14 + $0xd0] sm:$0xff] }
  0xb9   : > { %v575_v18 = vmul.f32 %v543_v10, %v511_v14 }
  0xba   : > { %v615_v23 = vadd.f32 %v1042_v43, %v576_v17  ;;  %v514_v25 = vadd.f32 %v1027_v34, %v475_v19  ;;  %v513_v26 = vadd.f32 %v1027_v34, %v474_v20  ;;  %v556_v20 = vld [vmem:[%s1022_s14 + $0xe8] sm:$0xff] }
  0xbb   : > { %v614_v24 = vadd.f32 %v1042_v43, %v575_v18  ;;  %v398_v27 = vpop.permute.xlu1 %397  ;;  %v393_v28 = vpop.permute.xlu0 %392 }
  0xbc   : > { %648 = vst.msk [vmem:[%s1052_s30 + $0x88] sm:$0xff] %vm630_vm0, %v615_v23  ;;  %v578_v29 = vmul.f32 %v546_v21, %v514_v25  ;;  %v577_v30 = vmul.f32 %v545_v22, %v513_v26  ;;  %v477_v31 = vmul.f32 %v1015_v33, %v398_v27  ;;  %v476_v32 = vmul.f32 %v1015_v33, %v393_v28  ;;  %v555_v21 = vld [vmem:[%s1022_s14 + $0xe0] sm:$0xff] }
  0xbd   : > { %647 = vst.msk [vmem:[%s1052_s30 + $0x80] sm:$0xff] %vm630_vm0, %v614_v24 }
  0xbe   : > { %v617_v37 = vadd.f32 %v1042_v43, %v578_v29  ;;  %v616_v38 = vadd.f32 %v1042_v43, %v577_v30  ;;  %v516_v39 = vadd.f32 %v1027_v34, %v477_v31  ;;  %v515_v40 = vadd.f32 %v1027_v34, %v476_v32  ;;  %v558_v32 = vld [vmem:[%s1022_s14 + $0xf8] sm:$0xff] }
  0xbf   : > { %v408_v41 = vpop.permute.xlu1 %407  ;;  %v403_v42 = vpop.permute.xlu0 %402 }
  0xc0   : > { %650 = vst.msk [vmem:[%s1052_s30 + $0x98] sm:$0xff] %vm630_vm0, %v617_v37  ;;  %649 = vst.msk [vmem:[%s1052_s30 + $0x90] sm:$0xff] %vm630_vm0, %v616_v38  ;;  %v580_v44 = vmul.f32 %v548_v35, %v516_v39  ;;  %v579_v45 = vmul.f32 %v547_v36, %v515_v40  ;;  %v479_v46 = vmul.f32 %v1015_v33, %v408_v41  ;;  %v557_v35 = vld [vmem:[%s1022_s14 + $0xf0] sm:$0xff]  ;;  %s828_s14 = sshll.u32 %s887_s13, 4  ;;  %s829_s14 = int_to_ptr.vmem [resolvable:$false] %s828_s14 }
  0xc1   : > { %v478_v47 = vmul.f32 %v1015_v33, %v403_v42  ;;  %s830_s15 = scalar_lea.vmem %s829_s14, 8192  ;;  %p831_p0 = scmp.lt.s32.totalorder %s1233_s8, %s829_s14 }
  0xc2   : > { %v619_v50 = vadd.f32 %v1042_v43, %v580_v44  ;;  %v618_v51 = vadd.f32 %v1042_v43, %v579_v45  ;;  %v518_v52 = vadd.f32 %v1027_v34, %v479_v46  ;;  %p832_p1 = scmp.lt.s32.totalorder %s830_s15, %s824_s12 }
  0xc3   : > { %v517_v53 = vadd.f32 %v1027_v34, %v478_v47  ;;  %v418_v54 = vpop.permute.xlu1 %417  ;;  %v413_v55 = vpop.permute.xlu0 %412 }
  0xc4   : > { %652 = vst.msk [vmem:[%s1052_s30 + $0xa8] sm:$0xff] %vm630_vm0, %v619_v50  ;;  %651 = vst.msk [vmem:[%s1052_s30 + $0xa0] sm:$0xff] %vm630_vm0, %v618_v51  ;;  %v582_v56 = vmul.f32 %v550_v48, %v518_v52  ;;  %v481_v58 = vmul.f32 %v1015_v33, %v418_v54  ;;  %v480_v59 = vmul.f32 %v1015_v33, %v413_v55  ;;  %p833_p2 = por %p832_p1, %p831_p0 }
  0xc5   : > { %v581_v57 = vmul.f32 %v549_v49, %v517_v53 }
  0xc6   : > { %v621_v62 = vadd.f32 %v1042_v43, %v582_v56  ;;  %v520_v0 = vadd.f32 %v1027_v34, %v481_v58  ;;  %v519_v1 = vadd.f32 %v1027_v34, %v480_v59  ;;  %p834_p3 = pnand %p833_p2, %p827_p13 }
  0xc7   : > { %v620_v63 = vadd.f32 %v1042_v43, %v581_v57  ;;  %v428_v2 = vpop.permute.xlu1 %427  ;;  %v423_v3 = vpop.permute.xlu0 %422 }
  0xc8   : > { %654 = vst.msk [vmem:[%s1052_s30 + $0xb8] sm:$0xff] %vm630_vm0, %v621_v62  ;;  %v584_v4 = vmul.f32 %v552_v60, %v520_v0  ;;  %v583_v5 = vmul.f32 %v551_v61, %v519_v1  ;;  %v483_v6 = vmul.f32 %v1015_v33, %v428_v2  ;;  %v482_v7 = vmul.f32 %v1015_v33, %v423_v3 }
  0xc9   : > { %653 = vst.msk [vmem:[%s1052_s30 + $0xb0] sm:$0xff] %vm630_vm0, %v620_v63 }
  0xca   : > { %v623_v10 = vadd.f32 %v1042_v43, %v584_v4  ;;  %v622_v11 = vadd.f32 %v1042_v43, %v583_v5  ;;  %v522_v12 = vadd.f32 %v1027_v34, %v483_v6  ;;  %v521_v13 = vadd.f32 %v1027_v34, %v482_v7 }
  0xcb   : > { %v438_v14 = vpop.permute.xlu1 %437  ;;  %v433_v15 = vpop.permute.xlu0 %432 }
  0xcc   : > { %656 = vst.msk [vmem:[%s1052_s30 + $0xc8] sm:$0xff] %vm630_vm0, %v623_v10  ;;  %655 = vst.msk [vmem:[%s1052_s30 + $0xc0] sm:$0xff] %vm630_vm0, %v622_v11  ;;  %v586_v16 = vmul.f32 %v554_v8, %v522_v12  ;;  %v585_v17 = vmul.f32 %v553_v9, %v521_v13  ;;  %v485_v18 = vmul.f32 %v1015_v33, %v438_v14 }
  0xcd   : > { %v484_v19 = vmul.f32 %v1015_v33, %v433_v15 }
  0xce   : > { %v625_v22 = vadd.f32 %v1042_v43, %v586_v16  ;;  %v624_v23 = vadd.f32 %v1042_v43, %v585_v17  ;;  %v524_v24 = vadd.f32 %v1027_v34, %v485_v18 }
  0xcf   : > { %v523_v25 = vadd.f32 %v1027_v34, %v484_v19  ;;  %v448_v26 = vpop.permute.xlu1 %447  ;;  %v443_v27 = vpop.permute.xlu0 %442 }
  0xd0   : > { %658 = vst.msk [vmem:[%s1052_s30 + $0xd8] sm:$0xff] %vm630_vm0, %v625_v22  ;;  %657 = vst.msk [vmem:[%s1052_s30 + $0xd0] sm:$0xff] %vm630_vm0, %v624_v23  ;;  %v588_v28 = vmul.f32 %v556_v20, %v524_v24  ;;  %v487_v30 = vmul.f32 %v1015_v33, %v448_v26  ;;  %v486_v31 = vmul.f32 %v1015_v33, %v443_v27 }
  0xd1   : > { %v587_v29 = vmul.f32 %v555_v21, %v523_v25 }
  0xd2   : > { %v627_v36 = vadd.f32 %v1042_v43, %v588_v28  ;;  %v526_v38 = vadd.f32 %v1027_v34, %v487_v30  ;;  %v525_v39 = vadd.f32 %v1027_v34, %v486_v31 }
  0xd3   : > { %v626_v37 = vadd.f32 %v1042_v43, %v587_v29 }
  0xd4   : > { %660 = vst.msk [vmem:[%s1052_s30 + $0xe8] sm:$0xff] %vm630_vm0, %v627_v36  ;;  %v590_v33 = vmul.f32 %v558_v32, %v526_v38  ;;  %v589_v40 = vmul.f32 %v557_v35, %v525_v39 }
  0xd5   : > { %659 = vst.msk [vmem:[%s1052_s30 + $0xe0] sm:$0xff] %vm630_vm0, %v626_v37 }
  0xd6   : > { %v629_v34 = vadd.f32 %v1042_v43, %v590_v33  ;;  %v628_v41 = vadd.f32 %v1042_v43, %v589_v40 }
  0xd8   : > { %662 = vst.msk [vmem:[%s1052_s30 + $0xf8] sm:$0xff] %vm630_vm0, %v629_v34  ;;  %661 = vst.msk [vmem:[%s1052_s30 + $0xf0] sm:$0xff] %vm630_vm0, %v628_v41 }
  0xd9   : > { %837 = shalt.err (!%p834_p3)
}
  0xda   : > { %s838_s16 = scalar_lea.hbm %s1231_s11, 4096  ;;  %s842_s25 = scalar_lea.hbm %s1288_s5, 8192 }
  0xdb   : > { %p839_p4 = scmp.ne.s32.totalorder %s1231_s11, %s838_s16  ;;  %p843_p9 = scmp.lt.s32.totalorder %s1231_s11, %s1288_s5 }
  0xdc   : > { %p844_p10 = scmp.lt.s32.totalorder %s842_s25, %s838_s16 }
  0xdd   : > { %p840_p7 = pnand %p839_p4, %p958_p5 }
  0xde   : > { %p845_p11 = por %p844_p10, %p843_p9 }
  0xdf   : > { %p841_p8 = pneg %p840_p7 }
  0xe1   : > { %p846_p12 = pnand %p845_p11, %p841_p8 }
  0xe3   : > { %849 = shalt.err (!%p846_p12)
}
  0xe4   : > { %s888_s30 = smov 128   ;;  %s889_s7 = smov 8  }
  0xe5   : > { %780 = dma.vmem_to_hbm [thread:$0]  (%p958_p5), %s1233_s8, 4096, %s1231_s11, %s1243_s22, %s888_s30, %s888_s30, %s889_s7  }
  0xe6 PF: > { %p786_p13 = scmp.ge.s32.totalorder %s884_s21, 2  ;;  %s692_s9 = sand.u32 1, %s872_s18  }
  0xe7   : > { %s693_s10 = scalar_lea.sflag [#allocation3], %s692_s9 }
  0xe8   : > { %p783_p0 = pnand %p786_p13, %p962_p6 }
  0xea   : > { %p784_p1 = pneg %p783_p0 }
  0xec   : > { %867 = dma.done.wait (%p784_p1), %s693_s10, 4096  }
  0xed   : > { %869 = vsyncadd (%p784_p1), %s693_s10, 4294963200  ;;  %p15_p2 = scmp.ge.s32.totalorder %s945_s24, 4   ;;  %s1291_s18 = smov %s876_s19 }
  0xee   : > { %s1292_s19 = smov %s880_s20  ;;  %s1293_s20 = smov %s956_s27 }
  0xef   : > { %s1294_s21 = smov %s945_s24  ;;  %17 = sbr.rel (!%p15_p2) target bundleno = 3 (0x3), region = 81 }
  0xf4   :  { %698 = vsyncpa [#allocation3], 1 }
  0xf5   :  { %700 = vsyncpa [#allocation3 + $0x1], 1 }

// kernel: fapm_forward.5
= control target key start
LH: loop header
LB: loop body
LE: loop exit
PB: predicated region body
PF: predicated region fallthrough
CT: control target
= control target key end

     0   :  { %s1831_s18 = smov 0   ;;  %s1956_s0 = inlined_call_operand.vmem [shape: f32[2,8,8], index: 0, kind: input, shape index: {}]   ;;  %s1957_s1 = inlined_call_operand.vmem [shape: f32[1,8], index: 1, kind: input, shape index: {}]   ;;  %s1958_s2 = inlined_call_operand.vmem [shape: f32[8,8], index: 2, kind: input, shape index: {}]   ;;  %s1959_s3 = inlined_call_operand.vmem [shape: f32[4,8], index: 3, kind: input, shape index: {}]   ;;  %s1960_s4 = inlined_call_operand.vmem [shape: f32[8,4], index: 4, kind: input, shape index: {}]   ;;  %s1961_s5 = inlined_call_operand.vmem [shape: f32[4,4], index: 5, kind: input, shape index: {}]   ;;  %s1962_s6 = inlined_call_operand.vmem [shape: f32[2,4], index: 6, kind: input, shape index: {}]   ;;  %s1963_s7 = inlined_call_operand.vmem [shape: f32[4,2], index: 7, kind: input, shape index: {}]   ;;  %s1964_s8 = inlined_call_operand.vmem [shape: f32[2,2], index: 8, kind: input, shape index: {}]   ;;  %s1965_s9 = inlined_call_operand.vmem [shape: f32[4,2], index: 9, kind: input, shape index: {}]   ;;  %s1966_s10 = inlined_call_operand.vmem [shape: f32[2,4], index: 10, kind: input, shape index: {}]   ;;  %s1967_s11 = inlined_call_operand.vmem [shape: f32[8,4], index: 11, kind: input, shape index: {}]   ;;  %s1968_s12 = inlined_call_operand.vmem [shape: f32[4,8], index: 12, kind: input, shape index: {}]   ;;  %s1969_s13 = inlined_call_operand.vmem [shape: f32[16,8], index: 13, kind: input, shape index: {}]   ;;  %s1970_s14 = inlined_call_operand.vmem [shape: f32[8,16], index: 14, kind: input, shape index: {}]   ;;  %s1971_s15 = inlined_call_operand.vmem [shape: f32[2,16,16], index: 15, kind: output, shape index: {}]  }
   0x1 LB: > { %s1587_s19 = sadd.s32 4294967295, %s1742_s18   ;;  %p1591_p0 = scmp.ge.s32.totalorder %s1742_s18, 1  ;;  %s1742_s18 = sphi %s1831_s18, %s25_s18  }
   0x2   : > { %p436_p1 = scmp.lt.s32.totalorder %s1742_s18, 3 }
   0x4   : > { %p437_p2 = pnand %p1591_p0, %p436_p1 }
   0x5   : > { %p483_p3 = scmp.lt.s32.totalorder (!%p437_p2), %s1587_s19, 1 }
   0x6   : > { %440 = sbr.rel (%p437_p2) target bundleno = 2167 (0x877), region = 80 }
   0xb   : > { %v1744_v0 = vmov 0.0   ;;  %vm1745_vm0 = vmmov 0   ;;  %s1973_s19 = smov (!%p483_p3, %s1587_s19), 1  ;;  %vm504_vm1 = vcmask 64512   ;;  %v579_v1 = vld [vmem:[%s1959_s3] sm:$0xf] }
   0xc   : > { %1655 = vmatprep.subr.mxu1 %v1744_v0  ;;  %1657 = vmatprep.mubr.msk.f32.mxu1 %vm1745_vm0, %v1744_v0  ;;  %s1592_s20 = sshll.u32 %s1973_s19, 3  ;;  %v493_v2 = vld [vmem:[%s1958_s2] sm:$0xff]  ;;  %v1746_v6 = vmov 4   ;;  %v1747_v7 = vmov 1   ;;  %v1748_v8 = vmov 2   ;;  %v1749_v9 = vmov 0  }
   0xd   : > { %1650 = vmatprep.subr.mxu0 %v1744_v0  ;;  %1652 = vmatprep.mubr.msk.f32.mxu0 %vm1745_vm0, %v1744_v0  ;;  %s486_s23 = scalar_lea.vmem %s1956_s0, %s1592_s20  ;;  %v653_v4 = vld [vmem:[%s1960_s4] sm:$0xff]  ;;  %vm741_vm2 = vcmask 1043456   ;;  %vm737_vm3 = vcmask 31744   ;;  %v1750_v22 = vmov 3   ;;  %vm981_vm4 = vcmask 1041408   ;;  %v1365_v59 = vld [vmem:[%s1969_s13 + $0x8] sm:$0xff] }
   0xe   : > { %v492_v3 = vld [vmem:[%s486_s23] sm:$0xff]  ;;  %1732 = vset.pattern.permute.xlu1 %v1746_v6  ;;  %1730 = vset.pattern.permute.xlu0 %v1747_v7  ;;  %vm977_vm5 = vcmask 15360   ;;  %s1621_s28 = sshll.u32 %s1973_s19, 4  ;;  %vm1529_vm6 = vcmask 130048  }
   0xf   : > { %1656 = vmatpush3.msra.mxu1 %v492_v3  ;;  %1651 = vmatpush3.msra.mxu0 %v492_v3  ;;  %v1595_v5 = vld [vmem:[%s1957_s1] ss:$0 sm:$0xff]  ;;  %s491_s16 = scalar_lea.vmem %s1971_s15, %s1621_s28 }
  0x10   : > { %1658 = vmatmul.mubr.msk.f32.vlgmr.msra.gmra.mxu1 %vm504_vm1, %v579_v1  ;;  %1653 = vmatmul.mubr.msk.f32.vlgmr.msra.gmra.mxu0 %vm504_vm1, %v493_v2  ;;  %v816_v19 = vld [vmem:[%s1962_s6] sm:$0x3] }
  0x11   : > { %1660 = vmatprep.subr.mxu0 %v1744_v0  ;;  %1662 = vmatprep.mubr.msk.f32.mxu0 %vm1745_vm0, %v1744_v0  ;;  %v732_v20 = vld [vmem:[%s1961_s5] sm:$0xf] }
  0x12   : > { %1665 = vmatprep.subr.mxu1 %v1744_v0  ;;  %1667 = vmatprep.mubr.msk.f32.mxu1 %vm1745_vm0, %v1744_v0  ;;  %v890_v21 = vld [vmem:[%s1963_s7] sm:$0xf] }
  0x13   : > { %1661 = vmatpush3.msra.mxu0 %v653_v4  ;;  %974 = vperm.xlu1 %1732, %v1595_v5   ;;  %v972_v32 = vld [vmem:[%s1964_s8] sm:$0x3] }
  0x14   : > { %1670 = vmatprep.subr.mxu0 %v1744_v0  ;;  %655 = vperm.xlu0 %1730, %v1595_v5   ;;  %v1056_v38 = vld [vmem:[%s1965_s9] sm:$0xf] }
  0x15   : > { %v1133_v39 = vld [vmem:[%s1966_s10] sm:$0x3] }
  0x16   : > { %v1210_v47 = vld [vmem:[%s1967_s11] sm:$0xff] }
  0x17   : > { %1733 = vset.pattern.permute.xlu1 %v1748_v8  ;;  %v1287_v49 = vld [vmem:[%s1968_s12] sm:$0xf] }
  0x18   : > { %734 = vperm.xlu1 %1733, %v1595_v5   ;;  %1731 = vset.pattern.permute.xlu0 %v1750_v22  ;;  %v1364_v52 = vld [vmem:[%s1969_s13] sm:$0xff] }
  0x19   : > { %892 = vperm.xlu0 %1731, %v1595_v5   ;;  %v1447_v60 = vld [vmem:[%s1970_s14] sm:$0xff] }
  0x1c   : > { %1734 = vset.pattern.permute.xlu1 %v1749_v9 }
  0x1d   : > { %501 = vperm.xlu1 %1734, %v1595_v5   ;;  %1735 = vset.pattern.permute.xlu0 %v1746_v6 }
  0x8e   : > { %v975_v33 = vpop.permute.xlu1 %974 }
  0x8f   : > { %v656_v14 = vpop.permute.xlu0 %655 }
  0x93   : > { %v735_v42 = vpop.permute.xlu1 %734 }
  0x94   : > { %v893_v27 = vpop.permute.xlu0 %892 }
  0x98   : > { %v502_v53 = vpop.permute.xlu1 %501 }
  0xd0   : > { %v649_v10 = vpop.f32.mrf.mxu1  ;;  %v1872_v11 = vpop.f32.mrf.mxu0 }
  0xd1   : > { %1663 = vmatmul.mubr.msk.f32.vlgmr.msra.gmra.mxu0 %vm504_vm1, %v649_v10  ;;  %v575_v54 = vadd.f32 %v1872_v11, %v502_v53 }
  0xd2   : > { %v1659_v12 = vpop.f32.mrf.mxu1  ;;  %v1654_v13 = vpop.f32.mrf.mxu0  ;;  %1672 = vmatprep.mubr.msk.f32.mxu0 %vm1745_vm0, %v1744_v0 }
  0xd3   : > { %v578_v55 = vmax.f32 %v575_v54, 0.0 }
 0x191   : > { %v727_v15 = vpop.f32.mrf.mxu0 }
 0x192   : > { %v728_v16 = vadd.f32 %v727_v15, %v656_v14 }
 0x193   : > { %v1664_v17 = vpop.f32.mrf.mxu0 }
 0x194   : > { %v731_v18 = vmax.f32 %v728_v16, 0.0 }
 0x196   : > { %1666 = vmatpush3.msk.msra.mxu1 %vm741_vm2, %v731_v18  ;;  %1671 = vmatpush3.msk.msra.mxu0 %vm741_vm2, %v731_v18 }
 0x197   : > { %1673 = vmatmul.mubr.msk.f32.vlgmr.msra.gmra.mxu0 %vm737_vm3, %v816_v19  ;;  %1668 = vmatmul.mubr.msk.f32.vlgmr.msra.gmra.mxu1 %vm737_vm3, %v732_v20 }
 0x198   : > { %1675 = vmatprep.subr.mxu1 %v1744_v0  ;;  %1677 = vmatprep.mubr.msk.f32.mxu1 %vm1745_vm0, %v1744_v0 }
 0x199   : > { %1680 = vmatprep.subr.mxu0 %v1744_v0  ;;  %1682 = vmatprep.mubr.msk.f32.mxu0 %vm1745_vm0, %v1744_v0 }
 0x19a   : > { %1676 = vmatpush3.msk.msra.mxu1 %vm741_vm2, %v890_v21 }
 0x19b   : > { %1685 = vmatprep.subr.mxu1 %v1744_v0 }
 0x257   : > { %v886_v23 = vpop.f32.mrf.mxu0  ;;  %v811_v24 = vpop.f32.mrf.mxu1 }
 0x258   : > { %1678 = vmatmul.mubr.msk.f32.vlgmr.msra.gmra.mxu1 %vm737_vm3, %v886_v23  ;;  %v812_v43 = vadd.f32 %v811_v24, %v735_v42 }
 0x259   : > { %v1674_v25 = vpop.f32.mrf.mxu0  ;;  %v1669_v26 = vpop.f32.mrf.mxu1  ;;  %1687 = vmatprep.mubr.msk.f32.mxu1 %vm1745_vm0, %v1744_v0 }
 0x25a   : > { %v815_v44 = vmax.f32 %v812_v43, 0.0 }
 0x318   : > { %v967_v28 = vpop.f32.mrf.mxu1 }
 0x319   : > { %v968_v29 = vadd.f32 %v967_v28, %v893_v27 }
 0x31a   : > { %v1679_v30 = vpop.f32.mrf.mxu1 }
 0x31b   : > { %v971_v31 = vmax.f32 %v968_v29, 0.0 }
 0x31d   : > { %1681 = vmatpush3.msk.msra.mxu0 %vm981_vm4, %v971_v31 }
 0x31e   : > { %1683 = vmatmul.mubr.msk.f32.vlgmr.msra.gmra.mxu0 %vm977_vm5, %v972_v32  ;;  %1690 = vmatprep.subr.mxu0 %v1744_v0 }
 0x31f   : > { %1692 = vmatprep.mubr.msk.f32.mxu0 %vm1745_vm0, %v1744_v0  ;;  %1691 = vmatpush3.msk.msra.mxu0 %vm981_vm4, %v1133_v39 }
 0x320   : > { %1700 = vmatprep.subr.mxu0 %v1744_v0 }
 0x3de   : > { %v1051_v34 = vpop.f32.mrf.mxu0 }
 0x3df   : > { %v1052_v35 = vadd.f32 %v1051_v34, %v975_v33 }
 0x3e0   : > { %v1684_v36 = vpop.f32.mrf.mxu0 }
 0x3e1   : > { %v1055_v37 = vmax.f32 %v1052_v35, 0.0 }
 0x3e3   : > { %1686 = vmatpush3.msk.msra.mxu1 %vm981_vm4, %v1055_v37 }
 0x3e4   : > { %1688 = vmatmul.mubr.msk.f32.vlgmr.msra.gmra.mxu1 %vm977_vm5, %v1056_v38  ;;  %1695 = vmatprep.subr.mxu1 %v1744_v0 }
 0x3e5   : > { %1697 = vmatprep.mubr.msk.f32.mxu1 %vm1745_vm0, %v1744_v0 }
 0x4a4   : > { %v1129_v40 = vpop.f32.mrf.mxu1 }
 0x4a5   : > { %1693 = vmatmul.mubr.msk.f32.vlgmr.msra.gmra.mxu0 %vm977_vm5, %v1129_v40 }
 0x4a6   : > { %v1689_v41 = vpop.f32.mrf.mxu1  ;;  %1702 = vmatprep.mubr.msk.f32.mxu0 %vm1745_vm0, %v1744_v0  ;;  %1701 = vmatpush3.msk.msra.mxu0 %vm741_vm2, %v1287_v49 }
 0x4a7   : > { %1710 = vmatprep.subr.mxu0 %v1447_v60 }
 0x565   : > { %v1206_v45 = vpop.f32.mrf.mxu0 }
 0x566   : > { %v1207_v46 = vadd.f32 %v1206_v45, %v815_v44 }
 0x567   : > { %v1694_v48 = vpop.f32.mrf.mxu0 }
 0x568   : > { %1696 = vmatpush3.msk.msra.mxu1 %vm741_vm2, %v1207_v46 }
 0x569   : > { %1698 = vmatmul.mubr.msk.f32.vlgmr.msra.gmra.mxu1 %vm737_vm3, %v1210_v47 }
 0x56a   : > { %1707 = vmatprep.mubr.msk.f32.mxu1 %vm504_vm1, %v1364_v52 }
 0x629   : > { %v1283_v50 = vpop.f32.mrf.mxu1 }
 0x62a   : > { %1703 = vmatmul.mubr.msk.f32.vlgmr.msra.gmra.mxu0 %vm737_vm3, %v1283_v50 }
 0x62b   : > { %v1699_v51 = vpop.f32.mrf.mxu1  ;;  %1711 = vmatpush3.msra.mxu0 %v1447_v60 }
 0x6ea   : > { %v1360_v56 = vpop.f32.mrf.mxu0 }
 0x6eb   : > { %v1361_v57 = vadd.f32 %v1360_v56, %v578_v55 }
 0x6ec   : > { %v1704_v58 = vpop.f32.mrf.mxu0 }
 0x6ed   : > { %1705 = vmatprep.subr.mxu1 %v1361_v57 }
 0x6ee   : > { %1706 = vmatpush3.msra.mxu1 %v1361_v57 }
 0x6ef   : > { %1708 = vmatmul.mubr.msk.f32.vlgmr.msra.gmra.mxu1 %vm504_vm1, %v1365_v59 }
 0x7af   : > { %v1709_v61 = vpop.f32.mrf.mxu1 }
 0x7b1   : > { %v1438_v62 = vpop.f32.mrf.mxu1 }
 0x7b2   : > { %1712 = vmatprep.mubr.msk.f32.mxu0 %vm504_vm1, %v1438_v62 }
 0x7b3   : > { %1713 = vmatmul.mubr.msk.f32.vlgmr.msra.gmra.mxu0 %vm504_vm1, %v1709_v61 }
 0x873   : > { %v1714_v63 = vpop.f32.mrf.mxu0 }
 0x874   : > { %1531 = vst.msk [vmem:[%s491_s16 + $0x8] sm:$0xff] %vm1529_vm6, %v1714_v63 }
 0x875   : > { %v1520_v0 = vpop.f32.mrf.mxu0 }
 0x876   : > { %1530 = vst.msk [vmem:[%s491_s16] sm:$0xff] %vm1529_vm6, %v1520_v0 }
 0x877 PF: > { %s25_s18 = sadd.s32 1, %s1742_s18  }
 0x878   : > { %p22_p4 = scmp.ge.s32.totalorder %s25_s18, 4  }
 0x87a   :  { %24 = sbr.rel (!%p22_p4) target bundleno = 1 (0x1), region = 110 }

</bundles_post_ra>
